<compile_context>
chip_gen: v7x
topology: tpu7x:2x2x1
jax: 0.10.0
libtpu: 0.0.40
codegen_flags: <defaults>
</compile_context>

<pallas_src>
import math

import jax
import jax.numpy as jnp
from jax.experimental import pallas as pl
from jax.experimental.pallas import tpu as pltpu


def _fused_residual_linear_kernel(x_ref, w_ref, b_ref, o_ref):
    """One row-tile of: out = x_packed @ w_packed + b_packed.

    x_ref: (TM, Kb)  packed activations      (pipelined / double-buffered)
    w_ref: (Kb, Nb)  block-diag weights with residual identity folded in (resident)
    b_ref: (1,  Nb)  packed bias             (resident; full-array block)
    o_ref: (TM, Nb)  packed output, Nb is a multiple of 128 -> lane-dense stores
    """
    acc = jnp.dot(
        x_ref[...],
        w_ref[...],
        preferred_element_type=jnp.float32,
        # Full-f32 MXU passes: the folded residual (identity column) is then an
        # exact f32 multiply-accumulate, matching the spec's f32 add up to
        # summation-order rounding.  MXU has huge slack here (memory-bound).
        precision=jax.lax.Precision.HIGHEST,
    )
    o_ref[...] = (acc + b_ref[...]).astype(o_ref.dtype)


def pack_residual_linear(w, b):
    """Precompute (once per weight) the packed weight/bias for the fused kernel.

    Returns (w_big, b_big, P):
      w_big: (P*H_in, P*H_out) block-diagonal weight with the residual identity
             folded in (out = x@w + b + x[:, :H_out]  ==  x @ (w + I_top) + b).
      b_big: (1, P*H_out) tiled bias.
      P    : row-packing factor so P*H_out is a multiple of 128.
    """
    H_in, H_out = w.shape
    assert H_out <= H_in, "ResidualWrapper fusion requires H_out <= H_in"

    P = 128 // math.gcd(128, H_out)
    if P > 64:
        # TODO(synk): degenerate tiny/odd H_out (P would blow up Kb); fall back
        # to unpacked layout (masked 16-lane stores) rather than huge kron.
        P = 1

    w_eff = w + jnp.eye(H_in, H_out, dtype=w.dtype)      # residual as identity block
    w_big = jnp.kron(jnp.eye(P, dtype=w.dtype), w_eff)   # (P*H_in, P*H_out) block-diag
    b_big = jnp.tile(b, P).reshape(1, P * H_out)         # (1, P*H_out)
    return w_big, b_big, P


def residual_wrapper_forward(x, w_big, b_big, P, *, tm_rows=16384):
    """ResidualWrapper(Linear) forward: (x @ w + b) + x[:, -S:, :H_out].

    x:           (B, S, H_in)
    w_big/b_big: output of pack_residual_linear (computed once per weight).
    tm_rows:     target ORIGINAL rows per grid step (~2 MiB x tile at Kb=256).
    """
    B, S, H_in = x.shape
    Kb, Nb = w_big.shape
    assert Kb == P * H_in, "packed weight does not match x feature dim"
    H_out = Nb // P
    itemsize = jnp.dtype(x.dtype).itemsize

    M = B * S
    # Zero-pad a few rows so M is a multiple of P (keeps the lane-dense Nb
    # layout; cheap compared to the masked-store P=1 fallback).
    M_pad = -(-M // P) * P
    x_flat = x.reshape(M, H_in)
    if M_pad != M:
        x_flat = jnp.pad(x_flat, ((0, M_pad - M), (0, 0)))
    Mp = M_pad // P
    x_r = x_flat.reshape(Mp, Kb)                         # contiguous reshape: free

    # --- row-tile size (packed rows) ---------------------------------------
    TM = max(8, min(Mp, (tm_rows // P) // 8 * 8))
    # Keep >= 2 grid tiles so v7x's 2 TensorCores both get work on the
    # "parallel" axis (no-op on v5e/v6e single-TC parts).
    if Mp >= 16:
        TM = min(TM, max(8, ((Mp + 1) // 2 + 7) // 8 * 8))
    # VMEM cap: double-buffered x+out tiles <= ~24 MiB (v7x has 64 MiB
    # physical per TC; v5e/v6e have 128 MiB).  ~8192 packed rows at Kb=256.
    max_tm_vmem = (24 * 1024 * 1024) // (2 * (Kb + Nb) * itemsize)
    TM = max(8, min(TM, max(8, max_tm_vmem // 8 * 8)))
    grid_m = pl.cdiv(Mp, TM)

    # --- VMEM budget / compiler params --------------------------------------
    # 2x (double-buffered) x+out tiles + resident weights/bias.
    est_vmem = (2 * TM * (Kb + Nb) + Kb * Nb + Nb) * itemsize
    vmem_limit = None
    if est_vmem > 12 * 1024 * 1024:
        # Past v5e's 16 MiB scoped-VMEM default (v6e/v7x default is 32 MiB):
        # raise it explicitly, with headroom, capped below v7x's 64 MiB part.
        vmem_limit = min(est_vmem + (8 << 20), 48 << 20)

    flops = 2 * Mp * Kb * Nb
    bytes_accessed = itemsize * (Mp * Kb + Kb * Nb + Nb + Mp * Nb)

    out_r = pl.pallas_call(
        _fused_residual_linear_kernel,
        out_shape=jax.ShapeDtypeStruct((Mp, Nb), x.dtype),
        grid_spec=pl.GridSpec(
            grid=(grid_m,),
            in_specs=[
                pl.BlockSpec((TM, Kb), lambda i: (i, 0)),   # x tile (pipelined)
                pl.BlockSpec((Kb, Nb), lambda i: (0, 0)),   # weights (resident)
                pl.BlockSpec((1, Nb), lambda i: (0, 0)),    # bias (resident)
            ],
            out_specs=pl.BlockSpec((TM, Nb), lambda i: (i, 0)),
        ),
        compiler_params=pltpu.CompilerParams(
            # Independent row tiles: shard across v7x's 2 TensorCores.
            dimension_semantics=("parallel",),
            vmem_limit_bytes=vmem_limit,
        ),
        cost_estimate=pl.CostEstimate(
            flops=flops, transcendentals=0, bytes_accessed=bytes_accessed),
    )(x_r, w_big, b_big)

    out_flat = out_r.reshape(M_pad, H_out)               # contiguous reshape: free
    if M_pad != M:
        out_flat = out_flat[:M]
    return out_flat.reshape(B, S, H_out)


if __name__ == "__main__":
    B, S, H_in, H_out = 4, 1024, 32, 16   # M=4096 rows, P=8 -> Mp=512 -> grid of 2

    key = jax.random.PRNGKey(0)
    kx, kw, kb = jax.random.split(key, 3)
    x = jax.random.normal(kx, (B, S, H_in), dtype=jnp.float32)
    w = jax.random.normal(kw, (H_in, H_out), dtype=jnp.float32) * 0.05
    b = jax.random.normal(kb, (H_out,), dtype=jnp.float32) * 0.05

    # Packed weight/bias are built ONCE per weight (not per forward call).
    w_big, b_big, P = pack_residual_linear(w, b)
    w_big, b_big = jax.block_until_ready((w_big, b_big))

    out = jax.block_until_ready(residual_wrapper_forward(x, w_big, b_big, P))

    # Pure-JAX reference of the literal ResidualWrapper semantics.
    delta = jnp.einsum("bsh,ho->bso", x, w) + b
    inputs = x[:, -delta.shape[1]:, :delta.shape[2]]
    ref = inputs + delta

    assert out.shape == ref.shape == (B, S, H_out)
    # With precision=HIGHEST the folded residual is an exact f32 MAC; the only
    # remaining difference vs the reference is summation-order rounding.
    assert jnp.allclose(out, ref, atol=1e-4, rtol=1e-4), \
        float(jnp.max(jnp.abs(out - ref)))

    print("KERNEL_OK")
</pallas_src>

<mosaic_0001>
module attributes {stable_mosaic.version = 11 : i64} {
  func.func @_fused_residual_linear_kernel(%arg0: i32, %arg1: memref<256x256xf32, #tpu.memory_space<vmem>>, %arg2: memref<256x128xf32, #tpu.memory_space<vmem>>, %arg3: memref<1x128xf32, #tpu.memory_space<vmem>>, %arg4: memref<256x128xf32, #tpu.memory_space<vmem>>) attributes {dimension_semantics = [#tpu.dimension_semantics<parallel>], iteration_bounds = array<i64: 2>, scalar_prefetch = 0 : i64, scratch_operands = 0 : i64, tpu.core_type = #tpu.core_type<tc>, window_params = [{transform_indices = @transform_0, window_bounds = array<i64: 256, 256>}, {pipeline_mode = #tpu.pipeline_mode<synchronous>, transform_indices = @transform_1, window_bounds = array<i64: 256, 128>}, {pipeline_mode = #tpu.pipeline_mode<synchronous>, transform_indices = @transform_2, window_bounds = array<i64: 1, 128>}, {transform_indices = @transform_3, window_bounds = array<i64: 256, 128>}]} {
    %c0 = arith.constant 0 : index
    %c0_0 = arith.constant 0 : index
    %0 = vector.load %arg1[%c0, %c0_0] : memref<256x256xf32, #tpu.memory_space<vmem>>, vector<256x256xf32>
    %c0_1 = arith.constant 0 : index
    %c0_2 = arith.constant 0 : index
    %1 = vector.load %arg2[%c0_1, %c0_2] : memref<256x128xf32, #tpu.memory_space<vmem>>, vector<256x128xf32>
    %cst = arith.constant dense<0.000000e+00> : vector<256x128xf32>
    %2 = tpu.matmul %0, %1, %cst {dimension_numbers = #tpu.dot_dimension_numbers<[1], [0], [0], [1], [0, 0, 1, 1], [], []>, precision = #tpu.contract_precision<fp32>} : vector<256x256xf32>, vector<256x128xf32>, vector<256x128xf32> -> vector<256x128xf32>
    %c0_3 = arith.constant 0 : index
    %c0_4 = arith.constant 0 : index
    %3 = vector.load %arg3[%c0_3, %c0_4] : memref<1x128xf32, #tpu.memory_space<vmem>>, vector<1x128xf32>
    %4 = vector.broadcast %3 : vector<1x128xf32> to vector<256x128xf32>
    %5 = arith.addf %2, %4 : vector<256x128xf32>
    %c0_5 = arith.constant 0 : index
    %c0_6 = arith.constant 0 : index
    %6 = vector.load %arg4[%c0_5, %c0_6] : memref<256x128xf32, #tpu.memory_space<vmem>>, vector<256x128xf32>
    tpu.vector_store %arg4[%c0_5, %c0_6], %5 {strides = array<i32>} : memref<256x128xf32, #tpu.memory_space<vmem>>, vector<256x128xf32>,
    return
  }
  func.func @transform_0(%arg0: i32) -> (i32, i32) {
    %c0_i32 = arith.constant 0 : i32
    %c0_i32_0 = arith.constant 0 : i32
    return %arg0, %c0_i32 : i32, i32
  }
  func.func @transform_1(%arg0: i32) -> (i32, i32) {
    %c0_i32 = arith.constant 0 : i32
    %c0_i32_0 = arith.constant 0 : i32
    %c0_i32_1 = arith.constant 0 : i32
    return %c0_i32, %c0_i32_0 : i32, i32
  }
  func.func @transform_2(%arg0: i32) -> (i32, i32) {
    %c0_i32 = arith.constant 0 : i32
    %c0_i32_0 = arith.constant 0 : i32
    %c0_i32_1 = arith.constant 0 : i32
    return %c0_i32, %c0_i32_0 : i32, i32
  }
  func.func @transform_3(%arg0: i32) -> (i32, i32) {
    %c0_i32 = arith.constant 0 : i32
    %c0_i32_0 = arith.constant 0 : i32
    return %arg0, %c0_i32 : i32, i32
  }
}

</mosaic_0001>

<bundles_post_ra>
// kernel: tpu_custom_call.1
= control target key start
LH: loop header
LB: loop body
LE: loop exit
PB: predicated region body
PF: predicated region fallthrough
CT: control target
= control target key end

     0   :  { %8 = vsyncpa [#allocation3], 0  ;;  %s5726_s0 = inlined_call_operand.hbm [shape: f32[512,256], index: 0, kind: input, shape index: {}]   ;;  %s5727_s1 = inlined_call_operand.hbm [shape: f32[256,128], index: 1, kind: input, shape index: {}]   ;;  %s5728_s2 = inlined_call_operand.vmem [shape: f32[1,128], index: 2, kind: input, shape index: {}]   ;;  %s5729_s3 = inlined_call_operand.hbm [shape: f32[512,128], index: 3, kind: output, shape index: {}]  }
   0x1   :  { %10 = vsyncpa [#allocation3 + $0x1], 0 }
   0x2   :  { %11 = vsyncpa [#allocation6], 0 }
   0x3   :  { %12 = vsyncpa [#allocation4], 0 }
   0x4   :  { %14 = vsyncpa [#allocation4 + $0x1], 0  ;;  %s3890_s12 = smov 0   ;;  %s3892_s13 = smov 0  }
   0x5   :  { %s3894_s14 = smov 0   ;;  %s3896_s15 = smov 0  }
   0x6 LB: > { %s3911_s16 = sadd.s32 4294967295, %s3858_s15   ;;  %s3037_s17 = sadd.s32 4294967294, %s3858_s15   ;;  %s3858_s15 = sphi %s3896_s15, %s6380_s15   ;;  %s3854_s14 = sphi %s3894_s14, %s6379_s14   ;;  %s3850_s13 = sphi %s3892_s13, %s6378_s13   ;;  %s3846_s12 = sphi %s3890_s12, %s6377_s12  }
   0x7   : > { %p40_p0 = scmp.ne.s32.totalorder %s3850_s13, %s3846_s12  ;;  %p5730_p1 = scmp.eq.s32.totalorder %s3911_s16, 0 }
   0x8   : > { %p112_p3 = scmp.eq.s32.totalorder %s3037_s17, 1  ;;  %p3038_p5 = scmp.ge.s32.totalorder %s3858_s15, 1 }
   0x9   : > { %p3920_p4 = por %p5730_p1, %p40_p0  ;;  %p119_p7 = scmp.lt.s32.totalorder %s3858_s15, 3 }
   0xa   : > { %p3925_p6 = por %p112_p3, %p40_p0  ;;  %s3860_s21 = smov [#allocation5]  }
   0xb   : > { %s5942_s18 = scalar_select %p3920_p4, 1, 0 }
   0xc   : > { %s5943_s19 = scalar_select %p3925_p6, 1, 0 }
   0xd   : > { %p3930_p8 = pnand %p3038_p5, %p119_p7  ;;  %s131_s22 = sshll.u32 %s3860_s21, 4  ;;  %s3934_s22 = int_to_ptr.vmem [resolvable:$true] %s131_s22 }
   0xe   : > { %s3946_s24 = sadd.s32 1, %s3858_s15   ;;  %s27_s25 = sadd.s32 1, %s3854_s14 }
   0xf   : > { %s5944_s20 = scalar_select %p3930_p8, 1, 0 }
  0x10   : > { %p3674_p9 = pneg %p3930_p8  ;;  %s24_s26 = ssub.s32 %s3858_s15, %s3946_s24 }
  0x11   : > { %s3730_s29 = scalar_lea.hbm %s5727_s1, 4096 }
  0x12   : > { %p3941_p11 = pnand %p3674_p9, %p5730_p1  ;;  %p3731_p12 = scmp.ne.s32.totalorder %s5727_s1, %s3730_s29 }
  0x13   : > { %p3737_p5 = scmp.lt.u32.totalorder %s3730_s29, %s5727_s1 }
  0x14   : > { %p3732_p13 = pneg %p3941_p11 }
  0x16   : > { %p3733_p0 = pnand %p3732_p13, %p3731_p12 }
  0x18   : > { %p3734_p3 = pneg %p3733_p0 }
  0x1a   : > { %p3739_p7 = pnand %p3737_p5, %p3734_p3 }
  0x1c   : > { %3742 = shalt.err (!%p3739_p7)
}
  0x1d   : > { %s3743_s7 = scalar_lea.vmem %s3934_s22, 4096  ;;  %p3751_p2 = scmp.lt.s32.totalorder %s3934_s22, %s3934_s22 }
  0x1e   : > { %p3744_p9 = scmp.ne.s32.totalorder %s3934_s22, %s3743_s7  ;;  %p3752_p6 = scmp.lt.s32.totalorder %s3743_s7, %s3743_s7 }
  0x20   : > { %p3746_p10 = pnand %p3744_p9, %p3732_p13  ;;  %p3753_p4 = por %p3752_p6, %p3751_p2 }
  0x22   : > { %p3747_p1 = pneg %p3746_p10 }
  0x24   : > { %p3754_p8 = pnand %p3753_p4, %p3747_p1 }
  0x26   : > { %3757 = shalt.err (!%p3754_p8)
}
  0x27   : > { %s3861_s8 = smov 128   ;;  %s3862_s9 = smov 8  }
  0x28   : > { %3677 = dma.hbm_to_vmem [thread:$0]  (!%p3941_p11), %s5727_s1, 4096, %s3934_s22, [#allocation6], %s3861_s8, %s3861_s8, %s3862_s9  }
  0x29   : > { %p25_p2 = scmp.eq.s32.totalorder %s24_s26, 0  ;;  %p34_p1 = scmp.ne.s32.totalorder %s3854_s14, %s3850_s13 }
  0x2a   : > { %p35_p4 = scmp.eq.s32.totalorder %s3858_s15, 0  ;;  %p3687_p6 = scmp.lt.s32.totalorder %s3858_s15, 2 }
  0x2b   : > { %s3977_s17 = scalar_select %p25_p2, %s3854_s14, %s27_s25  }
  0x2c   : > { %p36_p8 = por %p35_p4, %p34_p1  ;;  %p5946_p10 = scmp.eq.s32.totalorder %s3911_s16, 1 }
  0x2d   : > { %s148_s27 = sand.u32 1, %s3854_s14   ;;  %s3056_s28 = sshll.u32 %s3858_s15, 13 }
  0x2e   : > { %p3981_p12 = por %p5946_p10, %p34_p1  ;;  %s3041_s29 = sshll.u32 %s148_s27, 9 }
  0x2f   : > { %s3990_s4 = scalar_lea.hbm %s5726_s0, %s3056_s28  ;;  %s152_s22 = scalar_lea.vmem [#allocation2], %s3041_s29 }
  0x30   : > { %s160_s25 = sshll.u32 %s152_s22, 4  ;;  %p3992_p11 = pnand %p3687_p6, %p36_p8  ;;  %s3996_s25 = int_to_ptr.vmem [resolvable:$true] %s160_s25 }
  0x31   : > { %s3998_s5 = scalar_lea.sflag [#allocation3], %s148_s27  ;;  %s3758_s6 = scalar_lea.hbm %s3990_s4, 8192 }
  0x32   : > { %p3759_p13 = scmp.ne.s32.totalorder %s3990_s4, %s3758_s6  ;;  %p3760_p0 = pneg %p3992_p11 }
  0x33   : > { %s3763_s9 = scalar_lea.hbm %s5726_s0, 16384  ;;  %p3764_p7 = scmp.lt.u32.totalorder %s3990_s4, %s5726_s0 }
  0x34   : > { %p3761_p3 = pnand %p3760_p0, %p3759_p13  ;;  %p3765_p9 = scmp.lt.u32.totalorder %s3763_s9, %s3758_s6 }
  0x35   : > { %p3767_p1 = scmp.lt.u32.totalorder %s3758_s6, %s3990_s4 }
  0x36   : > { %p3762_p5 = pneg %p3761_p3  ;;  %p3766_p2 = por %p3765_p9, %p3764_p7 }
  0x38   : > { %p3768_p4 = por %p3767_p1, %p3766_p2 }
  0x3a   : > { %p3769_p6 = pnand %p3768_p4, %p3762_p5 }
  0x3c   : > { %3772 = shalt.err (!%p3769_p6)
}
  0x3d   : > { %s3773_s27 = scalar_lea.vmem %s3996_s25, 8192  ;;  %s3863_s28 = smov [#allocation2]  }
  0x3e   : > { %p3774_p8 = scmp.ne.s32.totalorder %s3996_s25, %s3773_s27  ;;  %s3778_s29 = sshll.u32 %s3863_s28, 4  ;;  %s3779_s29 = int_to_ptr.vmem [resolvable:$false] %s3778_s29 }
  0x3f   : > { %s3780_s23 = scalar_lea.vmem %s3779_s29, 16384  ;;  %p3781_p3 = scmp.lt.s32.totalorder %s3996_s25, %s3779_s29 }
  0x40   : > { %p3776_p10 = pnand %p3774_p8, %p3760_p0  ;;  %p3782_p7 = scmp.lt.s32.totalorder %s3780_s23, %s3773_s27 }
  0x42   : > { %p3777_p13 = pneg %p3776_p10  ;;  %p3783_p9 = por %p3782_p7, %p3781_p3 }
  0x44   : > { %p3784_p2 = pnand %p3783_p9, %p3777_p13 }
  0x46   : > { %3787 = shalt.err (!%p3784_p2)
}
  0x47   : > { %s3864_s30 = smov 256   ;;  %s3865_s22 = smov 16  }
  0x48   : > { %3681 = dma.hbm_to_vmem [thread:$0]  (!%p3992_p11), %s3990_s4, 8192, %s3996_s25, %s3998_s5, %s3864_s30, %s3864_s30, %s3865_s22  }
  0x49   : > { %p5949_p0 = scmp.ne.s32.totalorder %s5944_s20, 0 }
  0x4b   : > { %172 = sbr.rel (%p5949_p0) target bundleno = 778 (0x30a), region = 32 }
  0x52   : > { %s4029_s6 = sand.u32 1, %s3850_s13   ;;  %p5950_p5 = scmp.ne.s32.totalorder %s5942_s18, 0 }
  0x53   : > { %s3046_s7 = sshll.u32 %s4029_s6, 9  ;;  %s175_s8 = scalar_lea.sflag [#allocation3], %s4029_s6 }
  0x54   : > { %s4033_s9 = scalar_lea.vmem [#allocation2], %s3046_s7 }
  0x55   : > { %3833 = dma.done.wait (%p5950_p5), %s175_s8, 8192  }
  0x56   : > { %3835 = vsyncadd (%p5950_p5), %s175_s8, 4294959104  ;;  %p5951_p11 = scmp.eq.s32.totalorder %s3911_s16, 0 }
  0x58   : > { %3837 = dma.done.wait (%p5951_p11), [#allocation6], 4096   ;;  %p5952_p1 = pmov %p5951_p11 }
  0x59   : > { %v5733_v0 = vmov 0.0|0.0   ;;  %v4045_v1 = vld [vmem:[#allocation5] sm:$0xff]  ;;  %v4047_v2 = vld [vmem:[#allocation5 + $0x8] sm:$0xff]  ;;  %v4049_v3 = vld [vmem:[#allocation5 + $0x10] sm:$0xff]  ;;  %s3048_s4 = sshll.u32 %s4029_s6, 8  ;;  %s3057_s26 = sshll.u32 %s3911_s16, 12 }
  0x5a   : > { %3839 = vsyncadd (%p5952_p1), [#allocation6], 4294963200  ;;  %3058 = vmatprep.subr.bf16.mxu1 %v5733_v0  ;;  %3202 = vmatprep.subr.bf16.mxu0 %v5733_v0  ;;  %v311_v4 = vand.u32 4294901760, %v4045_v1  ;;  %v314_v5 = vand.u32 4294901760, %v4047_v2  ;;  %v4053_v6 = vld [vmem:[#allocation5 + $0x18] sm:$0xff]  ;;  %v317_v7 = vand.u32 4294901760, %v4049_v3  ;;  %s5679_s27 = scalar_lea.hbm %s5729_s3, %s3057_s26 }
  0x5b   : > { %v320_v8 = vand.u32 4294901760, %v4053_v6  ;;  %v4057_v9 = vld [vmem:[#allocation5 + $0x20] sm:$0xff]  ;;  %v4059_v10 = vld [vmem:[#allocation5 + $0x28] sm:$0xff]  ;;  %v4079_v15 = vld [vmem:[#allocation5 + $0x30] sm:$0xff]  ;;  %s5610_s25 = scalar_lea.vmem [#allocation7], %s3048_s4  ;;  %s2941_s16 = scalar_lea.sflag [#allocation4], %s4029_s6 }
  0x5c   : > { %v4065_v11 = vpack.c.bf16 %v314_v5, %v311_v4  ;;  %v323_v13 = vand.u32 4294901760, %v4057_v9  ;;  %v326_v14 = vand.u32 4294901760, %v4059_v10  ;;  %v4081_v16 = vld [vmem:[#allocation5 + $0x38] sm:$0xff]  ;;  %v329_v18 = vand.u32 4294901760, %v4079_v15  ;;  %v4095_v20 = vld [vmem:[#allocation5 + $0x40] sm:$0xff]  ;;  %v4097_v21 = vld [vmem:[#allocation5 + $0x48] sm:$0xff] }
  0x5d   : > { %v4073_v12 = vpack.c.bf16 %v320_v8, %v317_v7  ;;  %v332_v19 = vand.u32 4294901760, %v4081_v16  ;;  %v335_v23 = vand.u32 4294901760, %v4095_v20  ;;  %v338_v24 = vand.u32 4294901760, %v4097_v21  ;;  %v4111_v25 = vld [vmem:[#allocation5 + $0x50] sm:$0xff]  ;;  %v4113_v26 = vld [vmem:[#allocation5 + $0x58] sm:$0xff]  ;;  %v208_v30 = vld [vmem:[%s4033_s9 + $0x8] sm:$0xff] }
  0x5e   : > { %5953 = vst [vmem:[#allocation11_spill] sm:$0xff] %v4065_v11  ;;  %3060 = vmatpush1.bf16.msra.mxu1 %v4065_v11  ;;  %3204 = vmatpush1.bf16.msra.mxu0 %v4065_v11  ;;  %v4089_v17 = vpack.c.bf16 %v326_v14, %v323_v13  ;;  %v341_v28 = vand.u32 4294901760, %v4111_v25  ;;  %v344_v29 = vand.u32 4294901760, %v4113_v26  ;;  %v4128_v31 = vld [vmem:[#allocation5 + $0x60] sm:$0xff]  ;;  %v4130_v32 = vld [vmem:[#allocation5 + $0x68] sm:$0xff]  ;;  %v4132_v33 = vand.u32 4294901760, %v208_v30 }
  0x5f   : > { %5954 = vst [vmem:[#allocation12_spill] sm:$0xff] %v4073_v12  ;;  %3061 = vmatprep.subr.bf16.mxu1 %v5733_v0  ;;  %3205 = vmatprep.subr.bf16.mxu0 %v5733_v0  ;;  %v4105_v22 = vpack.c.bf16 %v332_v19, %v329_v18  ;;  %v4121_v27 = vpack.c.bf16 %v338_v24, %v335_v23  ;;  %v347_v35 = vand.u32 4294901760, %v4128_v31  ;;  %v350_v36 = vand.u32 4294901760, %v4130_v32  ;;  %v4146_v37 = vld [vmem:[#allocation5 + $0x70] sm:$0xff]  ;;  %v4148_v38 = vld [vmem:[#allocation5 + $0x78] sm:$0xff]  ;;  %v4166_v44 = vld [vmem:[#allocation5 + $0x80] sm:$0xff] }
  0x60   : > { %5955 = vst [vmem:[#allocation13_spill] sm:$0xff] %v4089_v17  ;;  %5958 = vst [vmem:[#allocation16_spill] sm:$0xff] %v4132_v33  ;;  %v4140_v34 = vpack.c.bf16 %v344_v29, %v341_v28  ;;  %v4151_v39 = vsub.f32 %v208_v30, %v4132_v33  ;;  %v353_v42 = vand.u32 4294901760, %v4146_v37  ;;  %v356_v43 = vand.u32 4294901760, %v4148_v38  ;;  %v4168_v45 = vld [vmem:[#allocation5 + $0x88] sm:$0xff]  ;;  %v289_v51 = vld [vmem:[#allocation5 + $0x90] sm:$0xff] }
  0x61   : > { %5956 = vst [vmem:[#allocation14_spill] sm:$0xff] %v4105_v22  ;;  %5957 = vst [vmem:[#allocation15_spill] sm:$0xff] %v4121_v27  ;;  %v4160_v41 = vpack.c.bf16 %v350_v36, %v347_v35  ;;  %v359_v49 = vand.u32 4294901760, %v4166_v44  ;;  %v362_v50 = vand.u32 4294901760, %v4168_v45  ;;  %v290_v52 = vld [vmem:[#allocation5 + $0x98] sm:$0xff]  ;;  %v365_v54 = vand.u32 4294901760, %v289_v51 }
  0x62   : > { %3063 = vmatpush1.bf16.msra.mxu1 %v4073_v12  ;;  %3207 = vmatpush1.bf16.msra.mxu0 %v4073_v12  ;;  %5959 = vst [vmem:[#allocation17_spill] sm:$0xff] %v4140_v34  ;;  %5960 = vst [vmem:[#allocation18_spill] sm:$0xff] %v4151_v39  ;;  %v408_v40 = vand.u32 4294901760, %v4151_v39  ;;  %v4173_v48 = vpack.c.bf16 %v356_v43, %v353_v42  ;;  %v368_v55 = vand.u32 4294901760, %v290_v52  ;;  %v291_v56 = vld [vmem:[#allocation5 + $0xa0] sm:$0xff]  ;;  %v292_v57 = vld [vmem:[#allocation5 + $0xa8] sm:$0xff] }
  0x63   : > { %3064 = vmatprep.subr.bf16.mxu1 %v5733_v0  ;;  %3208 = vmatprep.subr.bf16.mxu0 %v5733_v0  ;;  %5961 = vst [vmem:[#allocation19_spill] sm:$0xff] %v4160_v41  ;;  %v4181_v53 = vpack.c.bf16 %v362_v50, %v359_v49  ;;  %v371_v59 = vand.u32 4294901760, %v291_v56  ;;  %v374_v60 = vand.u32 4294901760, %v292_v57  ;;  %v4192_v61 = vsub.f32 %v4045_v1, %v311_v4  ;;  %v293_v63 = vld [vmem:[#allocation5 + $0xb0] sm:$0xff]  ;;  %v294_v30 = vld [vmem:[#allocation5 + $0xb8] sm:$0xff]  ;;  %v215_v11 = vld [vmem:[%s4033_s9 + $0x40] sm:$0xff] }
  0x64   : > { %v409_v46 = vsub.f32 %v4151_v39, %v408_v40  ;;  %1852 = vmatprep.mubr.f32.mxu0 %v408_v40  ;;  %5962 = vst [vmem:[#allocation20_spill] sm:$0xff] %v4173_v48  ;;  %v4187_v58 = vpack.c.bf16 %v368_v55, %v365_v54  ;;  %v4197_v62 = vsub.f32 %v4047_v2, %v314_v5  ;;  %v4316_v39 = vld [vmem:[#allocation5 + $0xf8] sm:$0xff]  ;;  %s2954_s5 = sshll.u32 %s5610_s25, 4  ;;  %s3867_s29 = smov [#allocation7]   ;;  %s5681_s5 = int_to_ptr.vmem [resolvable:$true] %s2954_s5 }
  0x65   : > { %5963 = vst [vmem:[#allocation21_spill] sm:$0xff] %v4181_v53  ;;  %5965 = vst [vmem:[#allocation23_spill] sm:$0xff] %v4192_v61  ;;  %v4204_v40 = vsub.f32 %v4049_v3, %v317_v7  ;;  %v4209_v1 = vsub.f32 %v4053_v6, %v320_v8  ;;  %v4214_v2 = vsub.f32 %v4057_v9, %v323_v13  ;;  %v295_v8 = vld [vmem:[#allocation5 + $0xc0] sm:$0xff]  ;;  %v296_v9 = vld [vmem:[#allocation5 + $0xc8] sm:$0xff]  ;;  %s3788_s28 = scalar_lea.vmem %s5681_s5, 4096  ;;  %s3792_s23 = sshll.u32 %s3867_s29, 4  ;;  %s3793_s23 = int_to_ptr.vmem [resolvable:$false] %s3792_s23 }
  0x66   : > { %3066 = vmatpush1.bf16.msra.mxu1 %v4089_v17  ;;  %3210 = vmatpush1.bf16.msra.mxu0 %v4089_v17  ;;  %v410_v47 = vand.u32 4294901760, %v409_v46  ;;  %5964 = vst [vmem:[#allocation22_spill] sm:$0xff] %v4187_v58  ;;  %5966 = vst [vmem:[#allocation24_spill] sm:$0xff] %v4197_v62  ;;  %v4219_v4 = vsub.f32 %v4059_v10, %v326_v14  ;;  %v4224_v3 = vsub.f32 %v4079_v15, %v329_v18  ;;  %p3789_p4 = scmp.ne.s32.totalorder %s5681_s5, %s3788_s28  ;;  %s3794_s30 = scalar_lea.vmem %s3793_s23, 8192 }
  0x67   : > { %3067 = vmatprep.subr.bf16.mxu1 %v5733_v0  ;;  %3211 = vmatprep.subr.bf16.mxu0 %v5733_v0  ;;  %5967 = vst [vmem:[#allocation25_spill] sm:$0xff] %v4204_v40  ;;  %5968 = vst [vmem:[#allocation26_spill] sm:$0xff] %v4209_v1  ;;  %v4229_v5 = vsub.f32 %v4081_v16, %v332_v19  ;;  %v4234_v6 = vsub.f32 %v4095_v20, %v335_v23  ;;  %v377_v14 = vand.u32 4294901760, %v293_v63  ;;  %v207_v16 = vld [vmem:[%s4033_s9] sm:$0xff]  ;;  %p3795_p10 = scmp.lt.s32.totalorder %s5681_s5, %s3793_s23  ;;  %p3796_p13 = scmp.lt.s32.totalorder %s3794_s30, %s3788_s28 }
  0x68   : > { %411 = vmatprep.mubr.f32.mxu1 %v410_v47  ;;  %5969 = vst [vmem:[#allocation27_spill] sm:$0xff] %v4214_v2  ;;  %5970 = vst [vmem:[#allocation28_spill] sm:$0xff] %v4219_v4  ;;  %v4239_v7 = vsub.f32 %v4097_v21, %v338_v24  ;;  %v4244_v10 = vsub.f32 %v4111_v25, %v341_v28  ;;  %v4248_v13 = vpack.c.bf16 %v374_v60, %v371_v59  ;;  %v297_v21 = vld [vmem:[#allocation5 + $0xd0] sm:$0xff]  ;;  %v298_v28 = vld [vmem:[#allocation5 + $0xd8] sm:$0xff]  ;;  %p3790_p6 = pnand %p3789_p4, %p3981_p12 }
  0x69   : > { %v380_v15 = vand.u32 4294901760, %v294_v30  ;;  %v4254_v18 = vsub.f32 %v4113_v26, %v344_v29  ;;  %v4259_v19 = vsub.f32 %v4128_v31, %v347_v35  ;;  %v4264_v20 = vsub.f32 %v4130_v32, %v350_v36  ;;  %v210_v29 = vld [vmem:[%s4033_s9 + $0x18] sm:$0xff]  ;;  %v209_v31 = vld [vmem:[%s4033_s9 + $0x10] sm:$0xff]  ;;  %5979 = vst [vmem:[#allocation37_spill] sm:$0xff] %v4316_v39  ;;  %p3797_p3 = por %p3796_p13, %p3795_p10 }
  0x6a   : > { %3069 = vmatpush1.bf16.msra.mxu1 %v4105_v22  ;;  %3213 = vmatpush1.bf16.msra.mxu0 %v4105_v22  ;;  %5971 = vst [vmem:[#allocation29_spill] sm:$0xff] %v4248_v13  ;;  %v4269_v23 = vsub.f32 %v4146_v37, %v353_v42  ;;  %v4272_v24 = vsub.f32 %v4148_v38, %v356_v43  ;;  %v383_v25 = vand.u32 4294901760, %v295_v8  ;;  %v386_v26 = vand.u32 4294901760, %v296_v9  ;;  %v212_v37 = vld [vmem:[%s4033_s9 + $0x28] sm:$0xff]  ;;  %p3791_p8 = pneg %p3790_p6 }
  0x6b   : > { %3070 = vmatprep.subr.bf16.mxu1 %v5733_v0  ;;  %3214 = vmatprep.subr.bf16.mxu0 %v5733_v0  ;;  %v4277_v35 = vsub.f32 %v4166_v44, %v359_v49  ;;  %v4280_v32 = vsub.f32 %v4168_v45, %v362_v50  ;;  %v4282_v36 = vsub.f32 %v289_v51, %v365_v54  ;;  %v4284_v46 = vand.u32 4294901760, %v207_v16  ;;  %v299_v49 = vld [vmem:[#allocation5 + $0xe0] sm:$0xff] }
  0x6c   : > { %v4287_v42 = vsub.f32 %v290_v52, %v368_v55  ;;  %v4290_v38 = vsub.f32 %v291_v56, %v371_v59  ;;  %v4293_v43 = vpack.c.bf16 %v380_v15, %v377_v14  ;;  %v389_v44 = vand.u32 4294901760, %v297_v21  ;;  %v211_v52 = vld [vmem:[%s4033_s9 + $0x20] sm:$0xff]  ;;  %p3798_p7 = pnand %p3797_p3, %p3791_p8 }
  0x6d   : > { %5972 = vst [vmem:[#allocation30_spill] sm:$0xff] %v4284_v46  ;;  %v4295_v47 = vsub.f32 %v292_v57, %v374_v60  ;;  %v392_v45 = vand.u32 4294901760, %v298_v28  ;;  %v4299_v50 = vand.u32 4294901760, %v210_v29  ;;  %v4301_v51 = vand.u32 4294901760, %v209_v31  ;;  %v300_v57 = vld [vmem:[#allocation5 + $0xe8] sm:$0xff] }
  0x6e   : > { %3072 = vmatpush1.bf16.msra.mxu1 %v4121_v27  ;;  %3216 = vmatpush1.bf16.msra.mxu0 %v4121_v27  ;;  %5973 = vst [vmem:[#allocation31_spill] sm:$0xff] %v4293_v43  ;;  %v4304_v54 = vsub.f32 %v293_v63, %v377_v14  ;;  %v4306_v55 = vsub.f32 %v294_v30, %v380_v15  ;;  %v4310_v59 = vand.u32 4294901760, %v212_v37  ;;  %v890_v63 = vand.u32 4294901760, %v4192_v61 }
  0x6f   : > { %3073 = vmatprep.subr.bf16.mxu1 %v5733_v0  ;;  %3217 = vmatprep.subr.bf16.mxu0 %v5733_v0  ;;  %5974 = vst [vmem:[#allocation32_spill] sm:$0xff] %v4299_v50  ;;  %5975 = vst [vmem:[#allocation33_spill] sm:$0xff] %v4301_v51  ;;  %v4308_v56 = vpack.c.bf16 %v386_v26, %v383_v25  ;;  %v4312_v60 = vsub.f32 %v295_v8, %v383_v25  ;;  %v897_v30 = vand.u32 4294901760, %v4197_v62 }
  0x70   : > { %5977 = vst [vmem:[#allocation35_spill] sm:$0xff] %v4310_v59  ;;  %v4325_v14 = vsub.f32 %v296_v9, %v386_v26  ;;  %v4327_v8 = vsub.f32 %v297_v21, %v389_v44  ;;  %v395_v15 = vand.u32 4294901760, %v299_v49  ;;  %v4329_v25 = vand.u32 4294901760, %v211_v52  ;;  %v213_v21 = vld [vmem:[%s4033_s9 + $0x30] sm:$0xff] }
  0x71   : > { %5976 = vst [vmem:[#allocation34_spill] sm:$0xff] %v4308_v56  ;;  %v4340_v9 = vsub.f32 %v209_v31, %v4301_v51  ;;  %v4343_v26 = vsub.f32 %v298_v28, %v392_v45  ;;  %v4348_v27 = vsub.f32 %v212_v37, %v4310_v59  ;;  %v891_v22 = vsub.f32 %v4192_v61, %v890_v63  ;;  %v216_v31 = vld [vmem:[%s4033_s9 + $0x48] sm:$0xff] }
  0x72   : > { %3075 = vmatpush1.bf16.msra.mxu1 %v4140_v34  ;;  %3219 = vmatpush1.bf16.msra.mxu0 %v4140_v34  ;;  %5981 = vst [vmem:[#allocation39_spill] sm:$0xff] %v4325_v14  ;;  %5982 = vst [vmem:[#allocation40_spill] sm:$0xff] %v4327_v8  ;;  %v4359_v28 = vsub.f32 %v211_v52, %v4329_v25  ;;  %v4382_v51 = vand.u32 4294901760, %v216_v31  ;;  %v6003_v59 = vand.u32 4294901760, %v4209_v1 }
  0x73   : > { %3076 = vmatprep.subr.bf16.mxu1 %v5733_v0  ;;  %3220 = vmatprep.subr.bf16.mxu0 %v5733_v0  ;;  %5983 = vst [vmem:[#allocation41_spill] sm:$0xff] %v4329_v25  ;;  %5987 = vst [vmem:[#allocation44_spill] sm:$0xff] %v4340_v9 }
  0x74   : > { %5988 = vst [vmem:[#allocation45_spill] sm:$0xff] %v4343_v26  ;;  %5989 = vst [vmem:[#allocation46_spill] sm:$0xff] %v4348_v27 }
  0x75   : > { %5991 = vst [vmem:[#allocation48_spill] sm:$0xff] %v4359_v28  ;;  %5999 = vst [vmem:[#allocation54_spill] sm:$0xff] %v4382_v51 }
  0x76   : > { %3078 = vmatpush1.bf16.msra.mxu1 %v4160_v41  ;;  %3222 = vmatpush1.bf16.msra.mxu0 %v4160_v41  ;;  %v4337_v41 = vsub.f32 %v210_v29, %v4299_v50  ;;  %v898_v29 = vsub.f32 %v4197_v62, %v897_v30 }
  0x77   : > { %3079 = vmatprep.subr.bf16.mxu1 %v5733_v0  ;;  %3223 = vmatprep.subr.bf16.mxu0 %v5733_v0 }
  0x78   : > { %5986 = vst [vmem:[#allocation43_spill] sm:$0xff] %v4337_v41  ;;  %v899_v12 = vand.u32 4294901760, %v898_v29  ;;  %v6005_v29 = vand.u32 4294901760, %v4337_v41 }
  0x7a   : > { %3081 = vmatpush1.bf16.msra.mxu1 %v4173_v48  ;;  %3225 = vmatpush1.bf16.msra.mxu0 %v4173_v48  ;;  %v398_v48 = vand.u32 4294901760, %v300_v57 }
  0x7b   : > { %3082 = vmatprep.subr.bf16.mxu1 %v5733_v0  ;;  %3226 = vmatprep.subr.bf16.mxu0 %v5733_v0 }
  0x7c   : > { %v4367_v34 = vpack.c.bf16 %v398_v48, %v395_v15  ;;  %v4373_v52 = vsub.f32 %v300_v57, %v398_v48  ;;  %v424_v57 = vsub.f32 %v4337_v41, %v6005_v29  ;;  %v925_v29 = vand.u32 4294901760, %v4219_v4 }
  0x7e   : > { %3084 = vmatpush1.bf16.msra.mxu1 %v4181_v53  ;;  %3228 = vmatpush1.bf16.msra.mxu0 %v4181_v53  ;;  %v5984_v53 = vmov 0.0|0.0   ;;  %5993 = vst [vmem:[#allocation50_spill] sm:$0xff] %v4367_v34  ;;  %5995 = vst [vmem:[#allocation52_spill] sm:$0xff] %v4373_v52 }
  0x7f   : > { %3085 = vmatprep.subr.bf16.mxu1 %v5733_v0  ;;  %3229 = vmatprep.subr.bf16.mxu0 %v5733_v0 }
  0x82   : > { %3087 = vmatpush1.bf16.msra.mxu1 %v4187_v58  ;;  %3231 = vmatpush1.bf16.msra.mxu0 %v4187_v58  ;;  %v214_v58 = vld [vmem:[%s4033_s9 + $0x38] sm:$0xff] }
  0x83   : > { %3088 = vmatprep.subr.bf16.mxu1 %v5733_v0  ;;  %3232 = vmatprep.subr.bf16.mxu0 %v5733_v0  ;;  %v4353_v17 = vand.u32 4294901760, %v214_v58 }
  0x85   : > { %5990 = vst [vmem:[#allocation47_spill] sm:$0xff] %v4353_v17  ;;  %v4391_v48 = vsub.f32 %v214_v58, %v4353_v17  ;;  %v218_v58 = vld [vmem:[%s4033_s9 + $0x58] sm:$0xff]  ;;  %v4416_v17 = vand.u32 4294901760, %v215_v11 }
  0x86   : > { %3090 = vmatpush1.bf16.msra.mxu1 %v4248_v13  ;;  %3234 = vmatpush1.bf16.msra.mxu0 %v4248_v13  ;;  %v4319_v13 = vsub.f32 %v207_v16, %v4284_v46  ;;  %v4334_v16 = vpack.c.bf16 %v392_v45, %v389_v44  ;;  %v4363_v44 = vand.u32 4294901760, %v213_v21  ;;  %v5997_v45 = vand.u32 4294901760, %v4316_v39  ;;  %v217_v39 = vld [vmem:[%s4033_s9 + $0x50] sm:$0xff] }
  0x87   : > { %3091 = vmatprep.subr.bf16.mxu1 %v5733_v0  ;;  %3235 = vmatprep.subr.bf16.mxu0 %v5733_v0  ;;  %v4314_v0 = vld [vmem:[#allocation5 + $0xf0] sm:$0xff]  ;;  %6001 = vst [vmem:[#allocation55_spill] sm:$0xff] %v4391_v48  ;;  %6007 = vst [vmem:[#allocation57_spill] sm:$0xff] %v4416_v17  ;;  %v4425_v46 = vsub.f32 %v216_v31, %v4382_v51  ;;  %v4430_v33 = vand.u32 4294901760, %v218_v58  ;;  %v926_v51 = vsub.f32 %v4219_v4, %v925_v29 }
  0x88   : > { %5978 = vst [vmem:[#allocation36_spill] sm:$0xff] %v4314_v0  ;;  %5980 = vst [vmem:[#allocation38_spill] sm:$0xff] %v4319_v13  ;;  %v5996_v37 = vand.u32 4294901760, %v4314_v0  ;;  %v4453_v52 = vand.u32 4294901760, %v217_v39  ;;  %v6014_v0 = vand.u32 4294901760, %v4391_v48  ;;  %v6016_v4 = vand.u32 4294901760, %v4204_v40 }
  0x89   : > { %5985 = vst [vmem:[#allocation42_spill] sm:$0xff] %v4334_v16  ;;  %5992 = vst [vmem:[#allocation49_spill] sm:$0xff] %v4363_v44 }
  0x8a   : > { %3093 = vmatpush1.bf16.msra.mxu1 %v4293_v43  ;;  %3237 = vmatpush1.bf16.msra.mxu0 %v4293_v43  ;;  %v4369_v43 = vsub.f32 %v299_v49, %v395_v15  ;;  %v4379_v25 = vpack.c.bf16 %v5997_v45, %v5996_v37  ;;  %v6000_v49 = vand.u32 4294901760, %v4319_v13  ;;  %v6002_v37 = vand.u32 4294901760, %v4204_v40  ;;  %6009 = vst [vmem:[#allocation58_spill] sm:$0xff] %v4425_v46 }
  0x8b   : > { %3094 = vmatprep.subr.bf16.mxu1 %v5984_v53  ;;  %3238 = vmatprep.subr.bf16.mxu0 %v5984_v53  ;;  %6010 = vst [vmem:[#allocation59_spill] sm:$0xff] %v4430_v33  ;;  %6013 = vst [vmem:[#allocation61_spill] sm:$0xff] %v4453_v52 }
  0x8c   : > { %5994 = vst [vmem:[#allocation51_spill] sm:$0xff] %v4369_v43  ;;  %5998 = vst [vmem:[#allocation53_spill] sm:$0xff] %v4379_v25  ;;  %v4388_v15 = vsub.f32 %v4319_v13, %v6000_v49  ;;  %v905_v45 = vsub.f32 %v4204_v40, %v6002_v37  ;;  %v912_v49 = vsub.f32 %v4209_v1, %v6003_v59  ;;  %v918_v59 = vand.u32 4294901760, %v4214_v2  ;;  %v221_v40 = vld [vmem:[%s4033_s9 + $0x70] sm:$0xff] }
  0x8d   : > { %v4458_v43 = vsub.f32 %v4391_v48, %v6014_v0  ;;  %v6017_v0 = vand.u32 4294901760, %v4209_v1 }
  0x8e   : > { %3096 = vmatpush1.bf16.msra.mxu1 %v4308_v56  ;;  %3240 = vmatpush1.bf16.msra.mxu0 %v4308_v56  ;;  %v892_v56 = vand.u32 4294901760, %v891_v22  ;;  %v4403_v22 = vsub.f32 %v213_v21, %v4363_v44  ;;  %v3251_v21 = vpack.c.bf16 %v897_v30, %v890_v63  ;;  %v6008_v44 = vand.u32 4294901760, %v4348_v27 }
  0x8f   : > { %3097 = vmatprep.subr.bf16.mxu1 %v5984_v53  ;;  %3241 = vmatprep.subr.bf16.mxu0 %v5984_v53  ;;  %v6011_v63 = vand.u32 4294901760, %v4359_v28  ;;  %v913_v31 = vand.u32 4294901760, %v912_v49  ;;  %v455_v26 = vand.u32 4294901760, %v4458_v43  ;;  %v6024_v43 = vand.u32 4294901760, %v4337_v41 }
  0x90   : > { %6004 = vst [vmem:[#allocation56_spill] sm:$0xff] %v4403_v22  ;;  %v4422_v50 = vsub.f32 %v4348_v27, %v6008_v44  ;;  %v3107_v62 = vpack.c.bf16 %v899_v12, %v892_v56  ;;  %v906_v44 = vand.u32 4294901760, %v905_v45  ;;  %v219_v12 = vld [vmem:[%s4033_s9 + $0x60] sm:$0xff]  ;;  %v425_v56 = vand.u32 4294901760, %v424_v57 }
  0x91   : > { %v4438_v30 = vsub.f32 %v4359_v28, %v6011_v63  ;;  %v919_v63 = vsub.f32 %v4214_v2, %v918_v59  ;;  %v4461_v57 = vsub.f32 %v218_v58, %v4430_v33  ;;  %v3254_v2 = vpack.c.bf16 %v6017_v0, %v6016_v4 }
  0x92   : > { %3099 = vmatpush1.bf16.msra.mxu1 %v4334_v16  ;;  %3243 = vmatpush1.bf16.msra.mxu0 %v4334_v16  ;;  %v6006_v16 = vand.u32 4294901760, %v4340_v9  ;;  %v440_v45 = vand.u32 4294901760, %v4422_v50  ;;  %v3110_v49 = vpack.c.bf16 %v913_v31, %v906_v44  ;;  %v6018_v58 = vand.u32 4294901760, %v4403_v22 }
  0x93   : > { %3100 = vmatprep.subr.bf16.mxu1 %v5984_v53  ;;  %3244 = vmatprep.subr.bf16.mxu0 %v5984_v53  ;;  %6015 = vst [vmem:[#allocation62_spill] sm:$0xff] %v4461_v57  ;;  %v932_v50 = vand.u32 4294901760, %v4224_v3  ;;  %v939_v44 = vand.u32 4294901760, %v4229_v5  ;;  %v6019_v31 = vand.u32 4294901760, %v4425_v46  ;;  %v927_v0 = vand.u32 4294901760, %v926_v51 }
  0x94   : > { %v4414_v37 = vsub.f32 %v4340_v9, %v6006_v16  ;;  %v416_v16 = vand.u32 4294901760, %v4388_v15  ;;  %v220_v15 = vld [vmem:[%s4033_s9 + $0x68] sm:$0xff]  ;;  %v4478_v33 = vsub.f32 %v4403_v22, %v6018_v58  ;;  %v4491_v58 = vsub.f32 %v217_v39, %v4453_v52 }
  0x95   : > { %v4488_v4 = vsub.f32 %v4425_v46, %v6019_v31  ;;  %v3257_v51 = vpack.c.bf16 %v925_v29, %v918_v59  ;;  %v224_v52 = vld [vmem:[%s4033_s9 + $0x88] sm:$0xff]  ;;  %v4519_v59 = vand.u32 4294901760, %v221_v40  ;;  %v6029_v39 = vand.u32 4294901760, %v4461_v57 }
  0x96   : > { %3102 = vmatpush1.bf16.msra.mxu1 %v4367_v34  ;;  %3246 = vmatpush1.bf16.msra.mxu0 %v4367_v34  ;;  %v431_v61 = vand.u32 4294901760, %v4414_v37  ;;  %v4447_v34 = vsub.f32 %v215_v11, %v4416_v17  ;;  %v4463_v11 = vand.u32 4294901760, %v220_v15  ;;  %v4465_v37 = vand.u32 4294901760, %v219_v12  ;;  %v222_v17 = vld [vmem:[%s4033_s9 + $0x78] sm:$0xff]  ;;  %6020 = vst [vmem:[#allocation63_spill] sm:$0xff] %v4491_v58 }
  0x97   : > { %3103 = vmatprep.subr.bf16.mxu1 %v5984_v53  ;;  %3247 = vmatprep.subr.bf16.mxu0 %v5984_v53  ;;  %v4493_v1 = vand.u32 4294901760, %v222_v17  ;;  %6026 = vst [vmem:[#allocation66_spill] sm:$0xff] %v4519_v59  ;;  %v470_v29 = vand.u32 4294901760, %v4488_v4  ;;  %v4537_v4 = vand.u32 4294901760, %v224_v52 }
  0x98   : > { %6012 = vst [vmem:[#allocation60_spill] sm:$0xff] %v4447_v34  ;;  %v4501_v14 = vsub.f32 %v220_v15, %v4463_v11  ;;  %v4504_v31 = vsub.f32 %v219_v12, %v4465_v37  ;;  %v6025_v15 = vand.u32 4294901760, %v4447_v34  ;;  %v940_v12 = vsub.f32 %v4229_v5, %v939_v44 }
  0x99   : > { %6030 = vst [vmem:[#allocation68_spill] sm:$0xff] %v4537_v4 }
  0x9a   : > { %3105 = vmatpush1.bf16.msra.mxu1 %v4379_v25  ;;  %3249 = vmatpush1.bf16.msra.mxu0 %v4379_v25  ;;  %v920_v25 = vand.u32 4294901760, %v919_v63  ;;  %v6021_v63 = vand.u32 4294901760, %v4319_v13  ;;  %6022 = vst [vmem:[#allocation64_spill] sm:$0xff] %v4501_v14  ;;  %6023 = vst [vmem:[#allocation65_spill] sm:$0xff] %v4504_v31  ;;  %v4515_v8 = vsub.f32 %v4447_v34, %v6025_v15  ;;  %v6028_v15 = vand.u32 4294901760, %v4340_v9 }
  0x9b   : > { %3106 = vmatprep.subr.bf16.mxu1 %v5984_v53  ;;  %3250 = vmatprep.subr.bf16.mxu0 %v5984_v53  ;;  %v6044_v9 = vand.u32 4294901760, %v4254_v18 }
  0x9c   : > { %v476_v41 = vand.u32 4294901760, %v4515_v8 }
  0x9d   : > { %417 = vmatmul.mubr.f32.vlgmr.msra.gmra.mrb[0].mxu1 %v416_v16  ;;  %1856 = vmatmul.mubr.f32.vlgmr.msra.gmra.mrb[0].mxu0 %v6021_v63  ;;  %v4533_v63 = vsub.f32 %v4461_v57, %v6029_v39  ;;  %v6039_v16 = vand.u32 4294901760, %v4501_v14 }
  0x9e   : > { %3108 = vmatpush1.bf16.msra.mxu1 %v3107_v62  ;;  %426 = vmatprep.mubr.f32.mxu1 %v425_v56  ;;  %v933_v62 = vsub.f32 %v4224_v3, %v932_v50  ;;  %v3113_v56 = vpack.c.bf16 %v927_v0, %v920_v25  ;;  %v223_v25 = vld [vmem:[%s4033_s9 + $0x80] sm:$0xff] }
  0x9f   : > { %1863 = vmatprep.mubr.f32.mxu0 %v6024_v43  ;;  %3252 = vmatpush1.bf16.msra.mxu0 %v3251_v21  ;;  %v4526_v43 = vsub.f32 %v222_v17, %v4493_v1  ;;  %v6031_v17 = vand.u32 4294901760, %v4348_v27  ;;  %v941_v27 = vand.u32 4294901760, %v940_v12  ;;  %v4562_v8 = vand.u32 4294901760, %v223_v25 }
  0xa0   : > { %3109 = vmatprep.subr.bf16.mxu1 %v5984_v53  ;;  %3253 = vmatprep.subr.bf16.mxu0 %v5984_v53  ;;  %v485_v12 = vand.u32 4294901760, %v4533_v63  ;;  %v4572_v21 = vsub.f32 %v4501_v14, %v6039_v16 }
  0xa1   : > { %6027 = vst [vmem:[#allocation67_spill] sm:$0xff] %v4526_v43  ;;  %432 = vmatmul.mubr.f32.gmra.mrb[2].mxu1 %v431_v61  ;;  %1867 = vmatmul.mubr.f32.gmra.mrb[2].mxu0 %v6028_v15  ;;  %v6032_v61 = vand.u32 4294901760, %v4234_v6  ;;  %v6033_v15 = vand.u32 4294901760, %v4239_v7  ;;  %6036 = vst [vmem:[#allocation70_spill] sm:$0xff] %v4562_v8 }
  0xa2   : > { %441 = vmatprep.mubr.f32.mxu1 %v440_v45  ;;  %1874 = vmatprep.mubr.f32.mxu0 %v6031_v17  ;;  %v934_v45 = vand.u32 4294901760, %v933_v62  ;;  %v4552_v17 = vsub.f32 %v221_v40, %v4519_v59  ;;  %v6037_v62 = vand.u32 4294901760, %v4438_v30  ;;  %v6038_v40 = vand.u32 4294901760, %v4359_v28  ;;  %v226_v30 = vld [vmem:[%s4033_s9 + $0x98] sm:$0xff] }
  0xa3   : > { %v947_v0 = vsub.f32 %v4234_v6, %v6032_v61  ;;  %v954_v39 = vsub.f32 %v4239_v7, %v6033_v15  ;;  %3111 = vmatpush1.bf16.msra.mxu1 %v3110_v49  ;;  %3255 = vmatpush1.bf16.msra.mxu0 %v3254_v2  ;;  %v6035_v61 = vand.u32 4294901760, %v4491_v58  ;;  %v3260_v49 = vpack.c.bf16 %v939_v44, %v932_v50 }
  0xa4   : > { %6034 = vst [vmem:[#allocation69_spill] sm:$0xff] %v4552_v17  ;;  %3112 = vmatprep.subr.bf16.mxu1 %v5984_v53  ;;  %3256 = vmatprep.subr.bf16.mxu0 %v5984_v53  ;;  %v4580_v50 = vsub.f32 %v224_v52, %v4537_v4  ;;  %v6042_v44 = vand.u32 4294901760, %v4391_v48  ;;  %v6043_v28 = vand.u32 4294901760, %v4244_v10  ;;  %v3116_v52 = vpack.c.bf16 %v941_v27, %v934_v45 }
  0xa5   : > { %v4559_v15 = vsub.f32 %v4491_v58, %v6035_v61  ;;  %447 = vmatmul.mubr.f32.gmra.mrb[4].mxu1 %v6037_v62  ;;  %1878 = vmatmul.mubr.f32.gmra.mrb[4].mxu0 %v6038_v40  ;;  %v6040_v61 = vand.u32 4294901760, %v4504_v31  ;;  %v948_v62 = vand.u32 4294901760, %v947_v0  ;;  %v955_v63 = vand.u32 4294901760, %v954_v39  ;;  %v225_v40 = vld [vmem:[%s4033_s9 + $0x90] sm:$0xff] }
  0xa6   : > { %6041 = vst [vmem:[#allocation71_spill] sm:$0xff] %v4580_v50  ;;  %456 = vmatprep.mubr.f32.mxu1 %v455_v26  ;;  %1885 = vmatprep.mubr.f32.mxu0 %v6042_v44  ;;  %v961_v16 = vsub.f32 %v4244_v10, %v6043_v28  ;;  %v6045_v28 = vand.u32 4294901760, %v4526_v43  ;;  %v4604_v27 = vsub.f32 %v223_v25, %v4562_v8  ;;  %v6049_v39 = vand.u32 4294901760, %v4403_v22  ;;  %v228_v22 = vld [vmem:[%s4033_s9 + $0xa8] sm:$0xff] }
  0xa7   : > { %v4577_v2 = vsub.f32 %v4504_v31, %v6040_v61  ;;  %v968_v61 = vsub.f32 %v4254_v18, %v6044_v9  ;;  %3114 = vmatpush1.bf16.msra.mxu1 %v3113_v56  ;;  %3258 = vmatpush1.bf16.msra.mxu0 %v3257_v51  ;;  %v491_v0 = vand.u32 4294901760, %v4559_v15  ;;  %v4606_v51 = vand.u32 4294901760, %v226_v30 }
  0xa8   : > { %3115 = vmatprep.subr.bf16.mxu1 %v5984_v53  ;;  %3259 = vmatprep.subr.bf16.mxu0 %v5984_v53  ;;  %v4601_v9 = vsub.f32 %v4526_v43, %v6045_v28  ;;  %6046 = vst [vmem:[#allocation72_spill] sm:$0xff] %v4604_v27  ;;  %v6048_v56 = vand.u32 4294901760, %v4478_v33  ;;  %v500_v45 = vand.u32 4294901760, %v4572_v21  ;;  %v4615_v44 = vand.u32 4294901760, %v225_v40 }
  0xa9   : > { %6047 = vst [vmem:[#allocation73_spill] sm:$0xff] %v4606_v51  ;;  %1889 = vmatmul.mubr.f32.gmra.mrb[6].mxu0 %v6049_v39  ;;  %v6051_v25 = vand.u32 4294901760, %v4425_v46  ;;  %v3119_v28 = vpack.c.bf16 %v955_v63, %v948_v62  ;;  %v6052_v26 = vand.u32 4294901760, %v4234_v6  ;;  %v6053_v33 = vand.u32 4294901760, %v4239_v7  ;;  %v227_v39 = vld [vmem:[%s4033_s9 + $0xa0] sm:$0xff] }
  0xaa   : > { %462 = vmatmul.mubr.f32.gmra.mrb[6].mxu1 %v6048_v56  ;;  %6050 = vst [vmem:[#allocation74_spill] sm:$0xff] %v4615_v44  ;;  %v962_v48 = vand.u32 4294901760, %v961_v16  ;;  %v969_v21 = vand.u32 4294901760, %v968_v61  ;;  %v6054_v15 = vand.u32 4294901760, %v4259_v19  ;;  %v6056_v16 = vand.u32 4294901760, %v4552_v17 }
  0xab   : > { %471 = vmatprep.mubr.f32.mxu1 %v470_v29  ;;  %1896 = vmatprep.mubr.f32.mxu0 %v6051_v25  ;;  %v3263_v56 = vpack.c.bf16 %v6053_v33, %v6052_v26  ;;  %v6055_v29 = vand.u32 4294901760, %v4264_v20  ;;  %v6059_v33 = vand.u32 4294901760, %v4580_v50  ;;  %v4655_v26 = vand.u32 4294901760, %v228_v22  ;;  %v230_v25 = vld [vmem:[%s4033_s9 + $0xb8] sm:$0xff] }
  0xac   : > { %3117 = vmatpush1.bf16.msra.mxu1 %v3116_v52  ;;  %3261 = vmatpush1.bf16.msra.mxu0 %v3260_v49  ;;  %v975_v13 = vsub.f32 %v4259_v19, %v6054_v15  ;;  %v4637_v61 = vsub.f32 %v4552_v17, %v6056_v16  ;;  %v4643_v52 = vsub.f32 %v226_v30, %v4606_v51  ;;  %v6058_v15 = vand.u32 4294901760, %v4447_v34 }
  0xad   : > { %v982_v62 = vsub.f32 %v4264_v20, %v6055_v29  ;;  %3118 = vmatprep.subr.bf16.mxu1 %v5984_v53  ;;  %3262 = vmatprep.subr.bf16.mxu0 %v5984_v53  ;;  %v4650_v29 = vsub.f32 %v4580_v50, %v6059_v33  ;;  %v4653_v16 = vsub.f32 %v225_v40, %v4615_v44  ;;  %v4657_v49 = vand.u32 4294901760, %v227_v39  ;;  %v232_v40 = vld [vmem:[%s4033_s9 + $0xc8] sm:$0xff] }
  0xae   : > { %6057 = vst [vmem:[#allocation75_spill] sm:$0xff] %v4643_v52  ;;  %477 = vmatmul.mubr.f32.gmra.mrb[8].mxu1 %v476_v41  ;;  %1900 = vmatmul.mubr.f32.gmra.mrb[8].mxu0 %v6058_v15  ;;  %6061 = vst [vmem:[#allocation77_spill] sm:$0xff] %v4655_v26  ;;  %v6063_v30 = vand.u32 4294901760, %v4461_v57  ;;  %v3122_v41 = vpack.c.bf16 %v969_v21, %v962_v48  ;;  %v6064_v15 = vand.u32 4294901760, %v4244_v10  ;;  %v6065_v63 = vand.u32 4294901760, %v4254_v18 }
  0xaf   : > { %6060 = vst [vmem:[#allocation76_spill] sm:$0xff] %v4653_v16  ;;  %6062 = vst [vmem:[#allocation78_spill] sm:$0xff] %v4657_v49  ;;  %486 = vmatprep.mubr.f32.mxu1 %v485_v12  ;;  %v5807_v33 = vand.u32 4294901760, %v4277_v35  ;;  %v976_v46 = vand.u32 4294901760, %v975_v13  ;;  %v983_v44 = vand.u32 4294901760, %v982_v62  ;;  %v6066_v12 = vand.u32 4294901760, %v4269_v23 }
  0xb0   : > { %1907 = vmatprep.mubr.f32.mxu0 %v6063_v30  ;;  %v3266_v34 = vpack.c.bf16 %v6065_v63, %v6064_v15  ;;  %3120 = vmatpush1.bf16.msra.mxu1 %v3119_v28  ;;  %v6067_v48 = vand.u32 4294901760, %v4272_v24  ;;  %v521_v63 = vand.u32 4294901760, %v4637_v61  ;;  %v6068_v30 = vand.u32 4294901760, %v4604_v27 }
  0xb1   : > { %3264 = vmatpush1.bf16.msra.mxu0 %v3263_v56  ;;  %v989_v57 = vsub.f32 %v4269_v23, %v6066_v12  ;;  %3121 = vmatprep.subr.bf16.mxu1 %v5984_v53  ;;  %v4683_v28 = vand.u32 4294901760, %v230_v25  ;;  %v6070_v56 = vand.u32 4294901760, %v4491_v58  ;;  %v530_v62 = vand.u32 4294901760, %v4650_v29 }
  0xb2   : > { %v996_v21 = vsub.f32 %v4272_v24, %v6067_v48  ;;  %v4678_v15 = vsub.f32 %v4604_v27, %v6068_v30  ;;  %3265 = vmatprep.subr.bf16.mxu0 %v5984_v53  ;;  %492 = vmatmul.mubr.f32.gmra.mrb[10].mxu1 %v491_v0  ;;  %v4690_v12 = vsub.f32 %v228_v22, %v4655_v26  ;;  %v229_v30 = vld [vmem:[%s4033_s9 + $0xb0] sm:$0xff]  ;;  %v6073_v13 = vand.u32 4294901760, %v4501_v14 }
  0xb3   : > { %6069 = vst [vmem:[#allocation79_spill] sm:$0xff] %v4683_v28  ;;  %1911 = vmatmul.mubr.f32.gmra.mrb[10].mxu0 %v6070_v56  ;;  %v4693_v48 = vsub.f32 %v227_v39, %v4657_v49  ;;  %501 = vmatprep.mubr.f32.mxu1 %v500_v45  ;;  %v1003_v0 = vsub.f32 %v4277_v35, %v5807_v33  ;;  %v6074_v29 = vand.u32 4294901760, %v4280_v32  ;;  %v6075_v45 = vand.u32 4294901760, %v4259_v19 }
  0xb4   : > { %6071 = vst [vmem:[#allocation80_spill] sm:$0xff] %v4690_v12  ;;  %1918 = vmatprep.mubr.f32.mxu0 %v6073_v13  ;;  %3123 = vmatpush1.bf16.msra.mxu1 %v3122_v41  ;;  %v3125_v39 = vpack.c.bf16 %v983_v44, %v976_v46  ;;  %v6076_v13 = vand.u32 4294901760, %v4264_v20  ;;  %v990_v58 = vand.u32 4294901760, %v989_v57  ;;  %v997_v49 = vand.u32 4294901760, %v996_v21 }
  0xb5   : > { %6072 = vst [vmem:[#allocation81_spill] sm:$0xff] %v4693_v48  ;;  %v1010_v56 = vsub.f32 %v4280_v32, %v6074_v29  ;;  %3267 = vmatpush1.bf16.msra.mxu0 %v3266_v34  ;;  %v536_v33 = vand.u32 4294901760, %v4678_v15  ;;  %v6077_v29 = vand.u32 4294901760, %v4643_v52  ;;  %v4718_v41 = vsub.f32 %v230_v25, %v4683_v28  ;;  %3124 = vmatprep.subr.bf16.mxu1 %v5984_v53 }
  0xb6   : > { %v3269_v14 = vpack.c.bf16 %v6076_v13, %v6075_v45  ;;  %v4720_v34 = vand.u32 4294901760, %v229_v30  ;;  %3268 = vmatprep.subr.bf16.mxu0 %v5984_v53  ;;  %v6080_v46 = vand.u32 4294901760, %v4577_v2  ;;  %v6081_v57 = vand.u32 4294901760, %v4504_v31  ;;  %v231_v13 = vld [vmem:[%s4033_s9 + $0xc0] sm:$0xff] }
  0xb7   : > { %v4715_v22 = vsub.f32 %v4643_v52, %v6077_v29  ;;  %6078 = vst [vmem:[#allocation82_spill] sm:$0xff] %v4718_v41  ;;  %v6082_v44 = vand.u32 4294901760, %v4653_v16  ;;  %v4735_v45 = vand.u32 4294901760, %v232_v40  ;;  %v6084_v29 = vand.u32 4294901760, %v4601_v9 }
  0xb8   : > { %6079 = vst [vmem:[#allocation83_spill] sm:$0xff] %v4720_v34  ;;  %507 = vmatmul.mubr.f32.gmra.mrb[12].mxu1 %v6080_v46  ;;  %1922 = vmatmul.mubr.f32.gmra.mrb[12].mxu0 %v6081_v57  ;;  %v6085_v2 = vand.u32 4294901760, %v4526_v43  ;;  %v234_v46 = vld [vmem:[%s4033_s9 + $0xd8] sm:$0xff]  ;;  %v1004_v57 = vand.u32 4294901760, %v1003_v0  ;;  %v1011_v61 = vand.u32 4294901760, %v1010_v56  ;;  %v6086_v31 = vand.u32 4294901760, %v4282_v36 }
  0xb9   : > { %v4731_v21 = vsub.f32 %v4653_v16, %v6082_v44  ;;  %6083 = vst [vmem:[#allocation84_spill] sm:$0xff] %v4735_v45  ;;  %516 = vmatprep.mubr.f32.mxu1 %v6084_v29  ;;  %v6087_v25 = vand.u32 4294901760, %v4287_v42  ;;  %3126 = vmatpush1.bf16.msra.mxu1 %v3125_v39  ;;  %v3128_v28 = vpack.c.bf16 %v997_v49, %v990_v58  ;;  %v6088_v9 = vand.u32 4294901760, %v4269_v23  ;;  %v233_v56 = vld [vmem:[%s4033_s9 + $0xd0] sm:$0xff] }
  0xba   : > { %1929 = vmatprep.mubr.f32.mxu0 %v6085_v2  ;;  %v1017_v44 = vsub.f32 %v4282_v36, %v6086_v31  ;;  %3270 = vmatpush1.bf16.msra.mxu0 %v3269_v14  ;;  %v6089_v29 = vand.u32 4294901760, %v4272_v24  ;;  %v545_v31 = vand.u32 4294901760, %v4715_v22  ;;  %v4760_v14 = vand.u32 4294901760, %v231_v13 }
  0xbb   : > { %v1024_v15 = vsub.f32 %v4287_v42, %v6087_v25  ;;  %v4758_v25 = vsub.f32 %v229_v30, %v4720_v34  ;;  %3127 = vmatprep.subr.bf16.mxu1 %v5984_v53  ;;  %3271 = vmatprep.subr.bf16.mxu0 %v5984_v53  ;;  %v6092_v58 = vand.u32 4294901760, %v4552_v17  ;;  %v6093_v49 = vand.u32 4294901760, %v4690_v12 }
  0xbc   : > { %v3272_v43 = vpack.c.bf16 %v6089_v29, %v6088_v9  ;;  %6091 = vst [vmem:[#allocation86_spill] sm:$0xff] %v4760_v14  ;;  %522 = vmatmul.mubr.f32.gmra.mrb[14].mxu1 %v521_v63  ;;  %v6094_v22 = vand.u32 4294901760, %v4693_v48  ;;  %v4775_v30 = vsub.f32 %v232_v40, %v4735_v45  ;;  %v4777_v29 = vand.u32 4294901760, %v234_v46 }
  0xbd   : > { %6090 = vst [vmem:[#allocation85_spill] sm:$0xff] %v4758_v25  ;;  %1933 = vmatmul.mubr.f32.gmra.mrb[14].mxu0 %v6092_v58  ;;  %v559_v39 = vsub.f32 %v4690_v12, %v6093_v49  ;;  %531 = vmatprep.mubr.f32.mxu1 %v530_v62  ;;  %v6097_v63 = vand.u32 4294901760, %v4580_v50  ;;  %v236_v58 = vld [vmem:[%s4033_s9 + $0xe8] sm:$0xff]  ;;  %v3131_v0 = vpack.c.bf16 %v1011_v61, %v1004_v57  ;;  %v6098_v2 = vand.u32 4294901760, %v4277_v35  ;;  %v238_v61 = vld [vmem:[%s4033_s9 + $0xf8] sm:$0xff] }
  0xbe   : > { %v4772_v9 = vsub.f32 %v4693_v48, %v6094_v22  ;;  %6095 = vst [vmem:[#allocation87_spill] sm:$0xff] %v4775_v30  ;;  %6096 = vst [vmem:[#allocation88_spill] sm:$0xff] %v4777_v29  ;;  %v6099_v49 = vand.u32 4294901760, %v4280_v32  ;;  %v1018_v34 = vand.u32 4294901760, %v1017_v44  ;;  %v1025_v22 = vand.u32 4294901760, %v1024_v15  ;;  %3129 = vmatpush1.bf16.msra.mxu1 %v3128_v28  ;;  %3273 = vmatpush1.bf16.msra.mxu0 %v3272_v43 }
  0xbf   : > { %1940 = vmatprep.mubr.f32.mxu0 %v6097_v63  ;;  %v6100_v40 = vand.u32 4294901760, %v4290_v38  ;;  %v6101_v62 = vand.u32 4294901760, %v4295_v47  ;;  %v551_v50 = vand.u32 4294901760, %v4731_v21  ;;  %v6102_v44 = vand.u32 4294901760, %v4718_v41  ;;  %3130 = vmatprep.subr.bf16.mxu1 %v5984_v53 }
  0xc0   : > { %v3275_v17 = vpack.c.bf16 %v6099_v49, %v6098_v2  ;;  %v4803_v15 = vsub.f32 %v231_v13, %v4760_v14  ;;  %3274 = vmatprep.subr.bf16.mxu0 %v5984_v53  ;;  %537 = vmatmul.mubr.f32.gmra.mrb[16].mxu1 %v536_v33  ;;  %v6104_v2 = vand.u32 4294901760, %v4604_v27  ;;  %v560_v21 = vand.u32 4294901760, %v559_v39 }
  0xc1   : > { %v1031_v45 = vsub.f32 %v4290_v38, %v6100_v40  ;;  %v1038_v63 = vsub.f32 %v4295_v47, %v6101_v62  ;;  %v4799_v28 = vsub.f32 %v4718_v41, %v6102_v44  ;;  %v4810_v49 = vsub.f32 %v234_v46, %v4777_v29  ;;  %v235_v44 = vld [vmem:[%s4033_s9 + $0xe0] sm:$0xff]  ;;  %546 = vmatprep.mubr.f32.mxu1 %v545_v31 }
  0xc2   : > { %6103 = vst [vmem:[#allocation89_spill] sm:$0xff] %v4803_v15  ;;  %1944 = vmatmul.mubr.f32.gmra.mrb[16].mxu0 %v6104_v2  ;;  %v4812_v40 = vand.u32 4294901760, %v233_v56  ;;  %v4814_v62 = vand.u32 4294901760, %v236_v58  ;;  %v6108_v13 = vand.u32 4294901760, %v4643_v52  ;;  %v566_v43 = vand.u32 4294901760, %v4772_v9  ;;  %3132 = vmatpush1.bf16.msra.mxu1 %v3131_v0 }
  0xc3   : > { %6105 = vst [vmem:[#allocation90_spill] sm:$0xff] %v4810_v49  ;;  %v5826_v33 = vand.u32 4294901760, %v4775_v30  ;;  %v3134_v57 = vpack.c.bf16 %v1025_v22, %v1018_v34  ;;  %v6109_v2 = vand.u32 4294901760, %v4282_v36  ;;  %v6110_v39 = vand.u32 4294901760, %v4287_v42  ;;  %3276 = vmatpush1.bf16.msra.mxu0 %v3275_v17  ;;  %3133 = vmatprep.subr.bf16.mxu1 %v5984_v53 }
  0xc4   : > { %6106 = vst [vmem:[#allocation91_spill] sm:$0xff] %v4812_v40  ;;  %6107 = vst [vmem:[#allocation92_spill] sm:$0xff] %v4814_v62  ;;  %1951 = vmatprep.mubr.f32.mxu0 %v6108_v13  ;;  %v1032_v27 = vand.u32 4294901760, %v1031_v45  ;;  %v1039_v29 = vand.u32 4294901760, %v1038_v63  ;;  %v6111_v31 = vand.u32 4294901760, %v4304_v54  ;;  %v6112_v13 = vand.u32 4294901760, %v4306_v55  ;;  %3277 = vmatprep.subr.bf16.mxu0 %v5984_v53 }
  0xc5   : > { %v3278_v46 = vpack.c.bf16 %v6110_v39, %v6109_v2  ;;  %v575_v34 = vand.u32 4294901760, %v4799_v28  ;;  %v6113_v22 = vand.u32 4294901760, %v4758_v25  ;;  %v4837_v17 = vand.u32 4294901760, %v235_v44  ;;  %552 = vmatmul.mubr.f32.gmra.mrb[18].mxu1 %v551_v50 }
  0xc6   : > { %v1045_v52 = vsub.f32 %v4304_v54, %v6111_v31  ;;  %v1052_v9 = vsub.f32 %v4306_v55, %v6112_v13  ;;  %v6115_v45 = vand.u32 4294901760, %v4653_v16  ;;  %v4845_v28 = vsub.f32 %v233_v56, %v4812_v40  ;;  %561 = vmatprep.mubr.f32.mxu1 %v560_v21  ;;  %v239_v31 = vld [vmem:[%s4033_s9 + $0x100] sm:$0xff]  ;;  %3135 = vmatpush1.bf16.msra.mxu1 %v3134_v57 }
  0xc7   : > { %v580_v2 = vsub.f32 %v4758_v25, %v6113_v22  ;;  %6114 = vst [vmem:[#allocation93_spill] sm:$0xff] %v4837_v17  ;;  %v4848_v39 = vsub.f32 %v236_v58, %v4814_v62  ;;  %v6118_v13 = vand.u32 4294901760, %v4690_v12  ;;  %v589_v50 = vsub.f32 %v4775_v30, %v5826_v33  ;;  %v6122_v58 = vld [vmem:[#allocation39_spill] sm:$0xff]  ;;  %v240_v62 = vld [vmem:[%s4033_s9 + $0x108] sm:$0xff]  ;;  %3279 = vmatpush1.bf16.msra.mxu0 %v3278_v46  ;;  %v242_v46 = vld [vmem:[%s4033_s9 + $0x118] sm:$0xff] }
  0xc8   : > { %1955 = vmatmul.mubr.f32.gmra.mrb[18].mxu0 %v6115_v45  ;;  %6116 = vst [vmem:[#allocation94_spill] sm:$0xff] %v4845_v28  ;;  %v4856_v22 = vand.u32 4294901760, %v238_v61  ;;  %v237_v45 = vld [vmem:[%s4033_s9 + $0xf0] sm:$0xff]  ;;  %v6120_v63 = vand.u32 4294901760, %v4290_v38  ;;  %v6121_v56 = vand.u32 4294901760, %v4295_v47  ;;  %v1065_v16 = vand.u32 4294901760, %v6122_v58  ;;  %3136 = vmatprep.subr.bf16.mxu1 %v5984_v53 }
  0xc9   : > { %6117 = vst [vmem:[#allocation95_spill] sm:$0xff] %v4848_v39  ;;  %1962 = vmatprep.mubr.f32.mxu0 %v6118_v13  ;;  %v3137_v21 = vpack.c.bf16 %v1039_v29, %v1032_v27  ;;  %v1046_v13 = vand.u32 4294901760, %v1045_v52  ;;  %v1053_v12 = vand.u32 4294901760, %v1052_v9  ;;  %v6123_v33 = vand.u32 4294901760, %v4312_v60  ;;  %3280 = vmatprep.subr.bf16.mxu0 %v5984_v53 }
  0xca   : > { %6119 = vst [vmem:[#allocation96_spill] sm:$0xff] %v4856_v22  ;;  %v3281_v0 = vpack.c.bf16 %v6121_v56, %v6120_v63  ;;  %v581_v14 = vand.u32 4294901760, %v580_v2  ;;  %v6124_v26 = vand.u32 4294901760, %v4803_v15  ;;  %v4873_v63 = vsub.f32 %v235_v44, %v4837_v17  ;;  %567 = vmatmul.mubr.f32.gmra.mrb[20].mxu1 %v566_v43 }
  0xcb   : > { %v1059_v40 = vsub.f32 %v4312_v60, %v6123_v33  ;;  %v1066_v27 = vsub.f32 %v6122_v58, %v1065_v16  ;;  %v6126_v52 = vand.u32 4294901760, %v4693_v48  ;;  %v6127_v29 = vand.u32 4294901760, %v4810_v49  ;;  %576 = vmatprep.mubr.f32.mxu1 %v575_v34  ;;  %3138 = vmatpush1.bf16.msra.mxu1 %v3137_v21 }
  0xcc   : > { %v595_v51 = vsub.f32 %v4803_v15, %v6124_v26  ;;  %6125 = vst [vmem:[#allocation39_spill] sm:$0xff] %v4873_v63  ;;  %v4885_v44 = vand.u32 4294901760, %v237_v45  ;;  %v6129_v9 = vand.u32 4294901760, %v4718_v41  ;;  %v590_v43 = vand.u32 4294901760, %v589_v50  ;;  %3282 = vmatpush1.bf16.msra.mxu0 %v3281_v0  ;;  %3139 = vmatprep.subr.bf16.mxu1 %v5984_v53  ;;  %v6136_v0 = vld [vmem:[#allocation40_spill] sm:$0xff] }
  0xcd   : > { %1966 = vmatmul.mubr.f32.gmra.mrb[20].mxu0 %v6126_v52  ;;  %v604_v57 = vsub.f32 %v4810_v49, %v6127_v29  ;;  %v4891_v2 = vsub.f32 %v238_v61, %v4856_v22  ;;  %v4893_v56 = vand.u32 4294901760, %v240_v62  ;;  %v4895_v52 = vand.u32 4294901760, %v239_v31  ;;  %3283 = vmatprep.subr.bf16.mxu0 %v5984_v53 }
  0xce   : > { %6128 = vst [vmem:[#allocation97_spill] sm:$0xff] %v4885_v44  ;;  %1973 = vmatprep.mubr.f32.mxu0 %v6129_v9  ;;  %v3140_v29 = vpack.c.bf16 %v1053_v12, %v1046_v13  ;;  %v6133_v26 = vand.u32 4294901760, %v4304_v54  ;;  %v6134_v33 = vand.u32 4294901760, %v4306_v55  ;;  %v1060_v34 = vand.u32 4294901760, %v1059_v40  ;;  %v241_v9 = vld [vmem:[%s4033_s9 + $0x110] sm:$0xff]  ;;  %582 = vmatmul.mubr.f32.gmra.mrb[22].mxu1 %v581_v14 }
  0xcf   : > { %6130 = vst [vmem:[#allocation98_spill] sm:$0xff] %v4891_v2  ;;  %6131 = vst [vmem:[#allocation99_spill] sm:$0xff] %v4893_v56  ;;  %v1067_v17 = vand.u32 4294901760, %v1066_v27  ;;  %v596_v41 = vand.u32 4294901760, %v595_v51  ;;  %v4902_v61 = vand.u32 4294901760, %v242_v46  ;;  %v1072_v12 = vand.u32 4294901760, %v6136_v0  ;;  %591 = vmatprep.mubr.f32.mxu1 %v590_v43 }
  0xd0   : > { %6132 = vst [vmem:[#allocation100_spill] sm:$0xff] %v4895_v52  ;;  %v3284_v48 = vpack.c.bf16 %v6134_v33, %v6133_v26  ;;  %v6137_v21 = vand.u32 4294901760, %v4758_v25  ;;  %v605_v13 = vand.u32 4294901760, %v604_v57  ;;  %v6138_v40 = vand.u32 4294901760, %v4845_v28  ;;  %v244_v57 = vld [vmem:[%s4033_s9 + $0x128] sm:$0xff]  ;;  %3141 = vmatpush1.bf16.msra.mxu1 %v3140_v29 }
  0xd1   : > { %6135 = vst [vmem:[#allocation101_spill] sm:$0xff] %v4902_v61  ;;  %v6139_v27 = vand.u32 4294901760, %v4848_v39  ;;  %v4917_v26 = vsub.f32 %v237_v45, %v4885_v44  ;;  %v6141_v50 = vand.u32 4294901760, %v4775_v30  ;;  %v1073_v25 = vsub.f32 %v6136_v0, %v1072_v12  ;;  %3142 = vmatprep.subr.bf16.mxu1 %v5984_v53 }
  0xd2   : > { %1977 = vmatmul.mubr.f32.gmra.mrb[22].mxu0 %v6137_v21  ;;  %v610_v51 = vsub.f32 %v4845_v28, %v6138_v40  ;;  %v4923_v21 = vsub.f32 %v240_v62, %v4893_v56  ;;  %v6143_v40 = vld [vmem:[#allocation45_spill] sm:$0xff]  ;;  %v4929_v8 = vsub.f32 %v239_v31, %v4895_v52  ;;  %v3143_v45 = vpack.c.bf16 %v1067_v17, %v1060_v34  ;;  %v6153_v52 = vld [vmem:[#allocation51_spill] sm:$0xff] }
  0xd3   : > { %v619_v33 = vsub.f32 %v4848_v39, %v6139_v27  ;;  %6140 = vst [vmem:[#allocation40_spill] sm:$0xff] %v4917_v26  ;;  %1984 = vmatprep.mubr.f32.mxu0 %v6141_v50  ;;  %v1079_v22 = vand.u32 4294901760, %v6143_v40  ;;  %v4931_v27 = vand.u32 4294901760, %v241_v9  ;;  %3285 = vmatpush1.bf16.msra.mxu0 %v3284_v48  ;;  %v6146_v43 = vand.u32 4294901760, %v4312_v60 }
  0xd4   : > { %6142 = vst [vmem:[#allocation102_spill] sm:$0xff] %v4923_v21  ;;  %6144 = vst [vmem:[#allocation45_spill] sm:$0xff] %v4929_v8  ;;  %v6147_v14 = vand.u32 4294901760, %v4873_v63  ;;  %v4939_v30 = vsub.f32 %v242_v46, %v4902_v61  ;;  %3286 = vmatprep.subr.bf16.mxu0 %v5984_v53  ;;  %v1074_v31 = vand.u32 4294901760, %v1073_v25  ;;  %597 = vmatmul.mubr.f32.gmra.mrb[24].mxu1 %v596_v41  ;;  %v6149_v48 = vand.u32 4294901760, %v4803_v15  ;;  %v243_v61 = vld [vmem:[%s4033_s9 + $0x120] sm:$0xff] }
  0xd5   : > { %6145 = vst [vmem:[#allocation103_spill] sm:$0xff] %v4931_v27  ;;  %v3287_v50 = vpack.c.bf16 %v1065_v16, %v6146_v43  ;;  %v1080_v29 = vsub.f32 %v6143_v40, %v1079_v22  ;;  %v611_v16 = vand.u32 4294901760, %v610_v51  ;;  %v620_v17 = vand.u32 4294901760, %v619_v33  ;;  %606 = vmatprep.mubr.f32.mxu1 %v605_v13  ;;  %v6154_v51 = vld [vmem:[#allocation36_spill] sm:$0xff]  ;;  %3144 = vmatpush1.bf16.msra.mxu1 %v3143_v45 }
  0xd6   : > { %v625_v62 = vsub.f32 %v4873_v63, %v6147_v14  ;;  %6148 = vst [vmem:[#allocation104_spill] sm:$0xff] %v4939_v30  ;;  %1988 = vmatmul.mubr.f32.gmra.mrb[24].mxu0 %v6149_v48  ;;  %v4947_v14 = vand.u32 4294901760, %v244_v57  ;;  %v6151_v46 = vand.u32 4294901760, %v4810_v49  ;;  %v6152_v43 = vand.u32 4294901760, %v4891_v2  ;;  %3145 = vmatprep.subr.bf16.mxu1 %v5984_v53 }
  0xd7   : > { %v1081_v15 = vand.u32 4294901760, %v1080_v29  ;;  %v1086_v48 = vand.u32 4294901760, %v6153_v52  ;;  %v6155_v33 = vand.u32 4294901760, %v6154_v51  ;;  %v4964_v49 = vsub.f32 %v241_v9, %v4931_v27  ;;  %3288 = vmatpush1.bf16.msra.mxu0 %v3287_v50  ;;  %v245_v50 = vld [vmem:[%s4033_s9 + $0x130] sm:$0xff] }
  0xd8   : > { %6150 = vst [vmem:[#allocation105_spill] sm:$0xff] %v4947_v14  ;;  %1995 = vmatprep.mubr.f32.mxu0 %v6151_v46  ;;  %v634_v25 = vsub.f32 %v4891_v2, %v6152_v43  ;;  %v246_v46 = vld [vmem:[%s4033_s9 + $0x138] sm:$0xff]  ;;  %v3290_v43 = vpack.c.bf16 %v1079_v22, %v1072_v12  ;;  %v626_v41 = vand.u32 4294901760, %v625_v62  ;;  %3289 = vmatprep.subr.bf16.mxu0 %v5984_v53  ;;  %v6157_v9 = vand.u32 4294901760, %v4845_v28 }
  0xd9   : > { %v4960_v34 = vsub.f32 %v6154_v51, %v6155_v33  ;;  %6156 = vst [vmem:[#allocation51_spill] sm:$0xff] %v4964_v49  ;;  %v3146_v56 = vpack.c.bf16 %v1081_v15, %v1074_v31  ;;  %v1087_v51 = vsub.f32 %v6153_v52, %v1086_v48  ;;  %612 = vmatmul.mubr.f32.gmra.mrb[26].mxu1 %v611_v16  ;;  %v6158_v33 = vand.u32 4294901760, %v4917_v26  ;;  %v6161_v15 = vld [vmem:[#allocation52_spill] sm:$0xff]  ;;  %v6162_v31 = vld [vmem:[#allocation37_spill] sm:$0xff] }
  0xda   : > { %1999 = vmatmul.mubr.f32.gmra.mrb[26].mxu0 %v6157_v9  ;;  %v4977_v22 = vsub.f32 %v244_v57, %v4947_v14  ;;  %v4979_v12 = vand.u32 4294901760, %v243_v61  ;;  %v1093_v62 = vand.u32 4294901760, %v6161_v15  ;;  %v6163_v29 = vand.u32 4294901760, %v6162_v31  ;;  %621 = vmatprep.mubr.f32.mxu1 %v620_v17 }
  0xdb   : > { %v640_v45 = vsub.f32 %v4917_v26, %v6158_v33  ;;  %v6164_v16 = vand.u32 4294901760, %v4848_v39  ;;  %v635_v9 = vand.u32 4294901760, %v634_v25  ;;  %v6165_v33 = vand.u32 4294901760, %v4923_v21  ;;  %3147 = vmatpush1.bf16.msra.mxu1 %v3146_v56  ;;  %3291 = vmatpush1.bf16.msra.mxu0 %v3290_v43  ;;  %v247_v39 = vld [vmem:[%s4033_s9 + $0x140] sm:$0xff]  ;;  %v250_v43 = vld [vmem:[%s4033_s9 + $0x158] sm:$0xff] }
  0xdc   : > { %6159 = vst [vmem:[#allocation36_spill] sm:$0xff] %v4977_v22  ;;  %6160 = vst [vmem:[#allocation106_spill] sm:$0xff] %v4979_v12  ;;  %v4986_v13 = vsub.f32 %v6162_v31, %v6163_v29  ;;  %v4993_v28 = vand.u32 4294901760, %v246_v46  ;;  %v6167_v14 = vand.u32 4294901760, %v4929_v8  ;;  %v248_v29 = vld [vmem:[%s4033_s9 + $0x148] sm:$0xff]  ;;  %v1088_v17 = vand.u32 4294901760, %v1087_v51  ;;  %3148 = vmatprep.subr.bf16.mxu1 %v5984_v53  ;;  %3292 = vmatprep.subr.bf16.mxu0 %v5984_v53 }
  0xdd   : > { %2006 = vmatprep.mubr.f32.mxu0 %v6164_v16  ;;  %v649_v57 = vsub.f32 %v4923_v21, %v6165_v33  ;;  %v1094_v31 = vsub.f32 %v6161_v15, %v1093_v62  ;;  %v6168_v25 = vand.u32 4294901760, %v4939_v30  ;;  %v5004_v33 = vand.u32 4294901760, %v245_v50  ;;  %627 = vmatmul.mubr.f32.gmra.mrb[28].mxu1 %v626_v41 }
  0xde   : > { %6166 = vst [vmem:[#allocation52_spill] sm:$0xff] %v4993_v28  ;;  %v655_v27 = vsub.f32 %v4929_v8, %v6167_v14  ;;  %v3293_v14 = vpack.c.bf16 %v1093_v62, %v1086_v48  ;;  %v6170_v44 = vand.u32 4294901760, %v4873_v63  ;;  %v641_v56 = vand.u32 4294901760, %v640_v45  ;;  %636 = vmatprep.mubr.f32.mxu1 %v635_v9 }
  0xdf   : > { %v664_v16 = vsub.f32 %v4939_v30, %v6168_v25  ;;  %6169 = vst [vmem:[#allocation37_spill] sm:$0xff] %v5004_v33  ;;  %v5012_v51 = vsub.f32 %v243_v61, %v4979_v12  ;;  %v1095_v25 = vand.u32 4294901760, %v1094_v31  ;;  %v6172_v4 = vand.u32 4294901760, %v4891_v2 }
  0xe0   : > { %2010 = vmatmul.mubr.f32.gmra.mrb[28].mxu0 %v6170_v44  ;;  %v650_v59 = vand.u32 4294901760, %v649_v57  ;;  %v5018_v48 = vsub.f32 %v246_v46, %v4993_v28  ;;  %v5020_v41 = vand.u32 4294901760, %v248_v29  ;;  %v1100_v44 = vand.u32 4294901760, %v4960_v34 }
  0xe1   : > { %6171 = vst [vmem:[#allocation107_spill] sm:$0xff] %v5012_v51  ;;  %2017 = vmatprep.mubr.f32.mxu0 %v6172_v4  ;;  %v656_v45 = vand.u32 4294901760, %v655_v27  ;;  %v6174_v62 = vand.u32 4294901760, %v4964_v49  ;;  %v3149_v63 = vpack.c.bf16 %v1095_v25, %v1088_v17  ;;  %3294 = vmatpush1.bf16.msra.mxu0 %v3293_v14  ;;  %v1107_v9 = vand.u32 4294901760, %v4986_v13 }
  0xe2   : > { %6173 = vst [vmem:[#allocation108_spill] sm:$0xff] %v5018_v48  ;;  %v665_v31 = vand.u32 4294901760, %v664_v16  ;;  %v5029_v4 = vsub.f32 %v245_v50, %v5004_v33  ;;  %v5031_v46 = vand.u32 4294901760, %v247_v39  ;;  %v1101_v57 = vsub.f32 %v4960_v34, %v1100_v44  ;;  %3295 = vmatprep.subr.bf16.mxu0 %v5984_v53  ;;  %642 = vmatmul.mubr.f32.gmra.mrb[30].mxu1 %v641_v56  ;;  %v252_v33 = vld [vmem:[%s4033_s9 + $0x168] sm:$0xff] }
  0xe3   : > { %v670_v61 = vsub.f32 %v4964_v49, %v6174_v62  ;;  %v6176_v27 = vand.u32 4294901760, %v4917_v26  ;;  %v6177_v17 = vand.u32 4294901760, %v4977_v22  ;;  %v684_v16 = vand.u32 4294901760, %v5012_v51  ;;  %651 = vmatprep.mubr.f32.mxu1 %v650_v59  ;;  %3150 = vmatpush1.bf16.msra.mxu1 %v3149_v63 }
  0xe4   : > { %6175 = vst [vmem:[#allocation109_spill] sm:$0xff] %v5029_v4  ;;  %v1108_v50 = vsub.f32 %v4986_v13, %v1107_v9  ;;  %v3296_v25 = vpack.c.bf16 %v1107_v9, %v1100_v44  ;;  %v6178_v62 = vand.u32 4294901760, %v4923_v21  ;;  %v693_v2 = vand.u32 4294901760, %v5018_v48  ;;  %3151 = vmatprep.subr.bf16.mxu1 %v5984_v53 }
  0xe5   : > { %2021 = vmatmul.mubr.f32.gmra.mrb[30].mxu0 %v6176_v27  ;;  %v679_v14 = vsub.f32 %v4977_v22, %v6177_v17  ;;  %v5046_v56 = vsub.f32 %v248_v29, %v5020_v41  ;;  %v5048_v26 = vand.u32 4294901760, %v250_v43  ;;  %v249_v27 = vld [vmem:[%s4033_s9 + $0x150] sm:$0xff]  ;;  %v1102_v17 = vand.u32 4294901760, %v1101_v57 }
  0xe6   : > { %2028 = vmatprep.mubr.f32.mxu0 %v6178_v62  ;;  %v1109_v28 = vand.u32 4294901760, %v1108_v50  ;;  %3297 = vmatpush1.bf16.msra.mxu0 %v3296_v25  ;;  %v671_v12 = vand.u32 4294901760, %v670_v61  ;;  %v699_v59 = vand.u32 4294901760, %v5029_v4  ;;  %v5054_v44 = vsub.f32 %v247_v39, %v5031_v46  ;;  %v251_v61 = vld [vmem:[%s4033_s9 + $0x160] sm:$0xff] }
  0xe7   : > { %6179 = vst [vmem:[#allocation110_spill] sm:$0xff] %v5046_v56  ;;  %3298 = vmatprep.subr.bf16.mxu0 %v5984_v53  ;;  %657 = vmatmul.mubr.f32.gmra.mrb[32].mxu1 %v656_v45  ;;  %v6181_v29 = vand.u32 4294901760, %v4929_v8  ;;  %v685_v9 = vsub.f32 %v5012_v51, %v684_v16  ;;  %v5061_v63 = vand.u32 4294901760, %v249_v27  ;;  %v5063_v57 = vand.u32 4294901760, %v252_v33 }
  0xe8   : > { %6180 = vst [vmem:[#allocation111_spill] sm:$0xff] %v5054_v44  ;;  %v3152_v50 = vpack.c.bf16 %v1109_v28, %v1102_v17  ;;  %666 = vmatprep.mubr.f32.mxu1 %v665_v31  ;;  %v6184_v39 = vand.u32 4294901760, %v4939_v30  ;;  %v680_v25 = vand.u32 4294901760, %v679_v14  ;;  %v694_v62 = vsub.f32 %v5018_v48, %v693_v2 }
  0xe9   : > { %2032 = vmatmul.mubr.f32.gmra.mrb[32].mxu0 %v6181_v29  ;;  %6182 = vst [vmem:[#allocation112_spill] sm:$0xff] %v5061_v63  ;;  %6183 = vst [vmem:[#allocation113_spill] sm:$0xff] %v5063_v57  ;;  %v708_v45 = vand.u32 4294901760, %v5046_v56  ;;  %v5071_v8 = vsub.f32 %v250_v43, %v5048_v26  ;;  %v254_v29 = vld [vmem:[%s4033_s9 + $0x178] sm:$0xff]  ;;  %v700_v28 = vsub.f32 %v5029_v4, %v699_v59  ;;  %v714_v31 = vand.u32 4294901760, %v5054_v44 }
  0xea   : > { %2039 = vmatprep.mubr.f32.mxu0 %v6184_v39  ;;  %3153 = vmatpush1.bf16.msra.mxu1 %v3152_v50  ;;  %v5078_v17 = vand.u32 4294901760, %v251_v61  ;;  %v6187_v14 = vand.u32 4294901760, %v4964_v49  ;;  %v686_v43 = vand.u32 4294901760, %v685_v9  ;;  %v5084_v50 = vsub.f32 %v249_v27, %v5061_v63  ;;  %v256_v9 = vld [vmem:[%s4033_s9 + $0x188] sm:$0xff] }
  0xeb   : > { %6185 = vst [vmem:[#allocation114_spill] sm:$0xff] %v5071_v8  ;;  %3154 = vmatprep.subr.bf16.mxu1 %v5984_v53  ;;  %672 = vmatmul.mubr.f32.gmra.mrb[34].mxu1 %v671_v12  ;;  %v5087_v39 = vsub.f32 %v252_v33, %v5063_v57  ;;  %v6190_v51 = vand.u32 4294901760, %v4977_v22  ;;  %v695_v4 = vand.u32 4294901760, %v694_v62  ;;  %v709_v48 = vsub.f32 %v5046_v56, %v708_v45  ;;  %v255_v56 = vld [vmem:[%s4033_s9 + $0x180] sm:$0xff] }
  0xec   : > { %6186 = vst [vmem:[#allocation115_spill] sm:$0xff] %v5078_v17  ;;  %6188 = vst [vmem:[#allocation116_spill] sm:$0xff] %v5084_v50  ;;  %681 = vmatprep.mubr.f32.mxu1 %v680_v25  ;;  %v723_v12 = vand.u32 4294901760, %v5071_v8  ;;  %v5093_v30 = vand.u32 4294901760, %v254_v29  ;;  %v701_v49 = vand.u32 4294901760, %v700_v28  ;;  %v715_v27 = vsub.f32 %v5054_v44, %v714_v31 }
  0xed   : > { %2043 = vmatmul.mubr.f32.gmra.mrb[34].mxu0 %v6187_v14  ;;  %6189 = vst [vmem:[#allocation117_spill] sm:$0xff] %v5087_v39  ;;  %v253_v14 = vld [vmem:[%s4033_s9 + $0x170] sm:$0xff]  ;;  %v5099_v33 = vsub.f32 %v251_v61, %v5078_v17  ;;  %v738_v25 = vand.u32 4294901760, %v5087_v39  ;;  %v710_v28 = vand.u32 4294901760, %v709_v48  ;;  %v5116_v17 = vand.u32 4294901760, %v255_v56 }
  0xee   : > { %2050 = vmatprep.mubr.f32.mxu0 %v6190_v51  ;;  %6191 = vst [vmem:[#allocation118_spill] sm:$0xff] %v5093_v30  ;;  %v729_v51 = vand.u32 4294901760, %v5084_v50  ;;  %v5103_v62 = vand.u32 4294901760, %v253_v14  ;;  %v724_v44 = vsub.f32 %v5071_v8, %v723_v12  ;;  %v5110_v61 = vsub.f32 %v254_v29, %v5093_v30  ;;  %v257_v29 = vld [vmem:[%s4033_s9 + $0x190] sm:$0xff] }
  0xef   : > { %6192 = vst [vmem:[#allocation119_spill] sm:$0xff] %v5099_v33  ;;  %687 = vmatmul.mubr.f32.gmra.mrb[36].mxu1 %v686_v43  ;;  %v258_v43 = vld [vmem:[%s4033_s9 + $0x198] sm:$0xff]  ;;  %v744_v21 = vand.u32 4294901760, %v5099_v33  ;;  %6195 = vst [vmem:[#allocation122_spill] sm:$0xff] %v5116_v17  ;;  %v716_v22 = vand.u32 4294901760, %v715_v27  ;;  %v5133_v27 = vsub.f32 %v255_v56, %v5116_v17 }
  0xf0   : > { %696 = vmatprep.mubr.f32.mxu1 %v695_v4  ;;  %6193 = vst [vmem:[#allocation120_spill] sm:$0xff] %v5110_v61  ;;  %v730_v4 = vsub.f32 %v5084_v50, %v729_v51  ;;  %v5121_v48 = vsub.f32 %v253_v14, %v5103_v62  ;;  %v725_v8 = vand.u32 4294901760, %v724_v44  ;;  %v753_v30 = vand.u32 4294901760, %v5110_v61 }
  0xf1   : > { %2054 = vmatmul.mubr.f32.gmra.mrb[36].mxu0 %v684_v16  ;;  %v5112_v16 = vand.u32 4294901760, %v256_v9  ;;  %v5128_v63 = vand.u32 4294901760, %v258_v43  ;;  %6199 = vst [vmem:[#allocation126_spill] sm:$0xff] %v5133_v27  ;;  %v5135_v14 = vand.u32 4294901760, %v257_v29 }
  0xf2   : > { %2061 = vmatprep.mubr.f32.mxu0 %v693_v2  ;;  %v739_v2 = vsub.f32 %v5087_v39, %v738_v25  ;;  %6196 = vst [vmem:[#allocation123_spill] sm:$0xff] %v5121_v48  ;;  %v731_v44 = vand.u32 4294901760, %v730_v4  ;;  %v774_v4 = vand.u32 4294901760, %v5133_v27 }
  0xf3   : > { %6194 = vst [vmem:[#allocation121_spill] sm:$0xff] %v5112_v16  ;;  %702 = vmatmul.mubr.f32.gmra.mrb[38].mxu1 %v701_v49  ;;  %v5126_v57 = vsub.f32 %v256_v9, %v5112_v16  ;;  %6198 = vst [vmem:[#allocation125_spill] sm:$0xff] %v5128_v63  ;;  %v260_v49 = vld [vmem:[%s4033_s9 + $0x1a8] sm:$0xff]  ;;  %v5143_v56 = vsub.f32 %v258_v43, %v5128_v63  ;;  %v261_v43 = vld [vmem:[%s4033_s9 + $0x1b0] sm:$0xff] }
  0xf4   : > { %711 = vmatprep.mubr.f32.mxu1 %v710_v28  ;;  %6200 = vst [vmem:[#allocation127_spill] sm:$0xff] %v5135_v14  ;;  %v759_v28 = vand.u32 4294901760, %v5121_v48  ;;  %v5145_v50 = vand.u32 4294901760, %v260_v49 }
  0xf5   : > { %2065 = vmatmul.mubr.f32.gmra.mrb[38].mxu0 %v699_v59  ;;  %6197 = vst [vmem:[#allocation124_spill] sm:$0xff] %v5126_v57  ;;  %v745_v59 = vsub.f32 %v5099_v33, %v744_v21  ;;  %v754_v33 = vsub.f32 %v5110_v61, %v753_v30  ;;  %v768_v39 = vand.u32 4294901760, %v5126_v57  ;;  %6201 = vst [vmem:[#allocation128_spill] sm:$0xff] %v5143_v56  ;;  %v783_v16 = vand.u32 4294901760, %v5143_v56 }
  0xf6   : > { %2072 = vmatprep.mubr.f32.mxu0 %v708_v45  ;;  %v740_v45 = vand.u32 4294901760, %v739_v2  ;;  %6202 = vst [vmem:[#allocation129_spill] sm:$0xff] %v5145_v50  ;;  %v5151_v2 = vsub.f32 %v257_v29, %v5135_v14  ;;  %v5162_v29 = vsub.f32 %v260_v49, %v5145_v50 }
  0xf7   : > { %717 = vmatmul.mubr.f32.gmra.mrb[40].mxu1 %v716_v22  ;;  %v259_v22 = vld [vmem:[%s4033_s9 + $0x1a0] sm:$0xff]  ;;  %v755_v63 = vand.u32 4294901760, %v754_v33  ;;  %v769_v17 = vsub.f32 %v5126_v57, %v768_v39  ;;  %v784_v50 = vsub.f32 %v5143_v56, %v783_v16 }
  0xf8   : > { %726 = vmatprep.mubr.f32.mxu1 %v725_v8  ;;  %6203 = vst [vmem:[#allocation130_spill] sm:$0xff] %v5151_v2  ;;  %v746_v8 = vand.u32 4294901760, %v745_v59  ;;  %v5154_v9 = vand.u32 4294901760, %v259_v22  ;;  %6205 = vst [vmem:[#allocation132_spill] sm:$0xff] %v5162_v29  ;;  %v775_v59 = vsub.f32 %v5133_v27, %v774_v4  ;;  %v263_v57 = vld [vmem:[%s4033_s9 + $0x1c0] sm:$0xff]  ;;  %v798_v14 = vand.u32 4294901760, %v5162_v29 }
  0xf9   : > { %2076 = vmatmul.mubr.f32.gmra.mrb[40].mxu0 %v714_v31  ;;  %v262_v31 = vld [vmem:[%s4033_s9 + $0x1b8] sm:$0xff]  ;;  %v770_v27 = vand.u32 4294901760, %v769_v17  ;;  %v785_v49 = vand.u32 4294901760, %v784_v50 }
  0xfa   : > { %2083 = vmatprep.mubr.f32.mxu0 %v723_v12  ;;  %v760_v12 = vsub.f32 %v5121_v48, %v759_v28  ;;  %v5156_v61 = vand.u32 4294901760, %v262_v31  ;;  %v5167_v48 = vand.u32 4294901760, %v261_v43  ;;  %v5170_v33 = vsub.f32 %v259_v22, %v5154_v9 }
  0xfb   : > { %732 = vmatmul.mubr.f32.gmra.mrb[42].mxu1 %v731_v44  ;;  %v789_v44 = vand.u32 4294901760, %v5151_v2  ;;  %v799_v56 = vsub.f32 %v5162_v29, %v798_v14 }
  0xfc   : > { %6204 = vst [vmem:[#allocation131_spill] sm:$0xff] %v5156_v61  ;;  %741 = vmatprep.mubr.f32.mxu1 %v740_v45  ;;  %6206 = vst [vmem:[#allocation133_spill] sm:$0xff] %v5167_v48  ;;  %v761_v45 = vand.u32 4294901760, %v760_v12  ;;  %v5187_v12 = vand.u32 4294901760, %v263_v57 }
  0xfd   : > { %2087 = vmatmul.mubr.f32.gmra.mrb[42].mxu0 %v729_v51  ;;  %v264_v51 = vld [vmem:[%s4033_s9 + $0x1c8] sm:$0xff]  ;;  %6207 = vst [vmem:[#allocation134_spill] sm:$0xff] %v5170_v33  ;;  %v790_v22 = vsub.f32 %v5151_v2, %v789_v44 }
  0xfe   : > { %2094 = vmatprep.mubr.f32.mxu0 %v738_v25  ;;  %v5173_v25 = vsub.f32 %v262_v31, %v5156_v61  ;;  %v5185_v31 = vsub.f32 %v261_v43, %v5167_v48  ;;  %6211 = vst [vmem:[#allocation138_spill] sm:$0xff] %v5187_v12  ;;  %v265_v43 = vld [vmem:[%s4033_s9 + $0x1d0] sm:$0xff]  ;;  %v268_v48 = vld [vmem:[%s4033_s9 + $0x1e8] sm:$0xff] }
  0xff   : > { %747 = vmatmul.mubr.f32.gmra.mrb[44].mxu1 %v746_v8  ;;  %v5180_v8 = vand.u32 4294901760, %v264_v51 }
 0x100   : > { %6208 = vst [vmem:[#allocation135_spill] sm:$0xff] %v5173_v25  ;;  %756 = vmatprep.mubr.f32.mxu1 %v755_v63  ;;  %6210 = vst [vmem:[#allocation137_spill] sm:$0xff] %v5185_v31  ;;  %v804_v63 = vand.u32 4294901760, %v5170_v33  ;;  %v813_v17 = vand.u32 4294901760, %v5173_v25 }
 0x101   : > { %2098 = vmatmul.mubr.f32.gmra.mrb[44].mxu0 %v744_v21  ;;  %6209 = vst [vmem:[#allocation136_spill] sm:$0xff] %v5180_v8  ;;  %v266_v21 = vld [vmem:[%s4033_s9 + $0x1d8] sm:$0xff]  ;;  %v5193_v61 = vsub.f32 %v264_v51, %v5180_v8 }
 0x102   : > { %2105 = vmatprep.mubr.f32.mxu0 %v753_v30  ;;  %v776_v30 = vand.u32 4294901760, %v775_v59  ;;  %v5195_v2 = vand.u32 4294901760, %v266_v21  ;;  %v5201_v59 = vsub.f32 %v263_v57, %v5187_v12  ;;  %v805_v50 = vsub.f32 %v5170_v33, %v804_v63 }
 0x103   : > { %762 = vmatmul.mubr.f32.gmra.mrb[46].mxu1 %v761_v45  ;;  %6212 = vst [vmem:[#allocation139_spill] sm:$0xff] %v5193_v61  ;;  %v791_v45 = vand.u32 4294901760, %v790_v22  ;;  %v800_v22 = vand.u32 4294901760, %v799_v56  ;;  %v828_v29 = vand.u32 4294901760, %v5193_v61  ;;  %v5213_v57 = vand.u32 4294901760, %v268_v48 }
 0x104   : > { %771 = vmatprep.mubr.f32.mxu1 %v770_v27  ;;  %6213 = vst [vmem:[#allocation140_spill] sm:$0xff] %v5195_v2  ;;  %6214 = vst [vmem:[#allocation141_spill] sm:$0xff] %v5201_v59  ;;  %v5205_v27 = vand.u32 4294901760, %v265_v43  ;;  %v5211_v8 = vsub.f32 %v266_v21, %v5195_v2  ;;  %v834_v33 = vand.u32 4294901760, %v5201_v59  ;;  %v806_v51 = vand.u32 4294901760, %v805_v50 }
 0x105   : > { %2109 = vmatmul.mubr.f32.gmra.mrb[46].mxu0 %v759_v28  ;;  %v819_v28 = vand.u32 4294901760, %v5185_v31  ;;  %6217 = vst [vmem:[#allocation144_spill] sm:$0xff] %v5213_v57  ;;  %v829_v21 = vsub.f32 %v5193_v61, %v828_v29  ;;  %v5227_v12 = vsub.f32 %v268_v48, %v5213_v57 }
 0x106   : > { %2116 = vmatprep.mubr.f32.mxu0 %v768_v39  ;;  %v814_v39 = vsub.f32 %v5173_v25, %v813_v17  ;;  %6215 = vst [vmem:[#allocation142_spill] sm:$0xff] %v5205_v27  ;;  %6216 = vst [vmem:[#allocation143_spill] sm:$0xff] %v5211_v8  ;;  %v843_v2 = vand.u32 4294901760, %v5211_v8  ;;  %v835_v50 = vsub.f32 %v5201_v59, %v834_v33 }
 0x107   : > { %777 = vmatmul.mubr.f32.gmra.mrb[48].mxu1 %v776_v30  ;;  %v270_v30 = vld [vmem:[%s4033_s9 + $0x1f8] sm:$0xff]  ;;  %v820_v25 = vsub.f32 %v5185_v31, %v819_v28  ;;  %6220 = vst [vmem:[#allocation147_spill] sm:$0xff] %v5227_v12  ;;  %v830_v48 = vand.u32 4294901760, %v829_v21 }
 0x108   : > { %786 = vmatprep.mubr.f32.mxu1 %v785_v49  ;;  %v815_v49 = vand.u32 4294901760, %v814_v39  ;;  %v5229_v31 = vand.u32 4294901760, %v270_v30  ;;  %v844_v61 = vsub.f32 %v5211_v8, %v843_v2 }
 0x109   : > { %2120 = vmatmul.mubr.f32.gmra.mrb[48].mxu0 %v774_v4  ;;  %v267_v4 = vld [vmem:[%s4033_s9 + $0x1e0] sm:$0xff] }
 0x10a   : > { %2127 = vmatprep.mubr.f32.mxu0 %v783_v16  ;;  %v5220_v16 = vsub.f32 %v265_v43, %v5205_v27  ;;  %v5222_v56 = vand.u32 4294901760, %v267_v4  ;;  %6221 = vst [vmem:[#allocation148_spill] sm:$0xff] %v5229_v31 }
 0x10b   : > { %792 = vmatmul.mubr.f32.gmra.mrb[50].mxu1 %v791_v45  ;;  %v269_v45 = vld [vmem:[%s4033_s9 + $0x1f0] sm:$0xff] }
 0x10c   : > { %6218 = vst [vmem:[#allocation145_spill] sm:$0xff] %v5220_v16  ;;  %6219 = vst [vmem:[#allocation146_spill] sm:$0xff] %v5222_v56  ;;  %801 = vmatprep.mubr.f32.mxu1 %v800_v22  ;;  %v849_v43 = vand.u32 4294901760, %v5220_v16  ;;  %v5235_v39 = vsub.f32 %v267_v4, %v5222_v56  ;;  %v3194_v22 = vpack.c.bf16 %v6143_v40, %v6136_v0  ;;  %v6279_v0 = vld [vmem:[#allocation50_spill] sm:$0xff]  ;;  %v6280_v40 = vld [vmem:[#allocation97_spill] sm:$0xff] }
 0x10d   : > { %2131 = vmatmul.mubr.f32.gmra.mrb[50].mxu0 %v789_v44  ;;  %v821_v44 = vand.u32 4294901760, %v820_v25  ;;  %v858_v25 = vand.u32 4294901760, %v5227_v12 }
 0x10e   : > { %2138 = vmatprep.mubr.f32.mxu0 %v798_v14  ;;  %6222 = vst [vmem:[#allocation149_spill] sm:$0xff] %v5235_v39  ;;  %v5237_v14 = vand.u32 4294901760, %v269_v45  ;;  %v850_v4 = vsub.f32 %v5220_v16, %v849_v43  ;;  %v864_v59 = vand.u32 4294901760, %v5235_v39  ;;  %v6303_v16 = vld [vmem:[#allocation140_spill] sm:$0xff] }
 0x10f   : > { %807 = vmatmul.mubr.f32.gmra.mrb[52].mxu1 %v806_v51  ;;  %v5244_v51 = vsub.f32 %v270_v30, %v5229_v31 }
 0x110   : > { %6223 = vst [vmem:[#allocation150_spill] sm:$0xff] %v5237_v14  ;;  %816 = vmatprep.mubr.f32.mxu1 %v815_v49  ;;  %v5249_v56 = vsub.f32 %v269_v45, %v5237_v14  ;;  %v859_v49 = vsub.f32 %v5227_v12, %v858_v25  ;;  %v851_v30 = vand.u32 4294901760, %v850_v4  ;;  %v3200_v4 = vpack.c.bf16 %v4986_v13, %v4960_v34  ;;  %v6287_v34 = vld [vmem:[#allocation106_spill] sm:$0xff]  ;;  %v6288_v13 = vld [vmem:[#allocation52_spill] sm:$0xff] }
 0x111   : > { %2142 = vmatmul.mubr.f32.gmra.mrb[52].mxu0 %v804_v63  ;;  %6224 = vst [vmem:[#allocation151_spill] sm:$0xff] %v5244_v51  ;;  %v836_v63 = vand.u32 4294901760, %v835_v50  ;;  %v873_v21 = vand.u32 4294901760, %v5244_v51  ;;  %v3197_v50 = vpack.c.bf16 %v6161_v15, %v6153_v52  ;;  %v6282_v52 = vld [vmem:[#allocation53_spill] sm:$0xff]  ;;  %v6283_v15 = vld [vmem:[#allocation100_spill] sm:$0xff]  ;;  %v6302_v12 = vld [vmem:[#allocation138_spill] sm:$0xff] }
 0x112   : > { %2149 = vmatprep.mubr.f32.mxu0 %v813_v17  ;;  %6225 = vst [vmem:[#allocation152_spill] sm:$0xff] %v5249_v56  ;;  %v845_v17 = vand.u32 4294901760, %v844_v61  ;;  %v860_v45 = vand.u32 4294901760, %v859_v49 }
 0x113   : > { %822 = vmatmul.mubr.f32.gmra.mrb[54].mxu1 %v821_v44  ;;  %v879_v44 = vand.u32 4294901760, %v5249_v56  ;;  %v6304_v8 = vld [vmem:[#allocation146_spill] sm:$0xff] }
 0x114   : > { %831 = vmatprep.mubr.f32.mxu1 %v830_v48 }
 0x115   : > { %2153 = vmatmul.mubr.f32.gmra.mrb[54].mxu0 %v819_v28  ;;  %v865_v28 = vsub.f32 %v5235_v39, %v864_v59  ;;  %v880_v48 = vsub.f32 %v5249_v56, %v879_v44  ;;  %v6299_v56 = vld [vmem:[#allocation131_spill] sm:$0xff]  ;;  %v6301_v39 = vld [vmem:[#allocation136_spill] sm:$0xff] }
 0x116   : > { %2160 = vmatprep.mubr.f32.mxu0 %v828_v29  ;;  %v874_v29 = vsub.f32 %v5244_v51, %v873_v21  ;;  %v6300_v51 = vld [vmem:[#allocation133_spill] sm:$0xff] }
 0x117   : > { %837 = vmatmul.mubr.f32.gmra.mrb[56].mxu1 %v836_v63  ;;  %v866_v61 = vand.u32 4294901760, %v865_v28  ;;  %v881_v63 = vand.u32 4294901760, %v880_v48  ;;  %v6233_v28 = vld [vmem:[#allocation26_spill] sm:$0xff]  ;;  %v6237_v48 = vld [vmem:[#allocation27_spill] sm:$0xff] }
 0x118   : > { %846 = vmatprep.mubr.f32.mxu1 %v845_v17  ;;  %v6228_v17 = vld [vmem:[#allocation24_spill] sm:$0xff] }
 0x119   : > { %2164 = vmatmul.mubr.f32.gmra.mrb[56].mxu0 %v834_v33  ;;  %v875_v33 = vand.u32 4294901760, %v874_v29  ;;  %v6235_v29 = vld [vmem:[#allocation35_spill] sm:$0xff] }
 0x11a   : > { %2171 = vmatprep.mubr.f32.mxu0 %v843_v2  ;;  %v6226_v2 = vld [vmem:[#allocation16_spill] sm:$0xff] }
 0x11b   : > { %852 = vmatmul.mubr.f32.gmra.mrb[58].mxu1 %v851_v30  ;;  %v6229_v30 = vld [vmem:[#allocation30_spill] sm:$0xff] }
 0x11c   : > { %861 = vmatprep.mubr.f32.mxu1 %v860_v45  ;;  %v6234_v45 = vld [vmem:[#allocation33_spill] sm:$0xff] }
 0x11d   : > { %2175 = vmatmul.mubr.f32.gmra.mrb[58].mxu0 %v849_v43  ;;  %v6227_v43 = vld [vmem:[#allocation23_spill] sm:$0xff] }
 0x11e   : > { %2182 = vmatprep.mubr.f32.mxu0 %v858_v25  ;;  %v3155_v49 = vpack.c.bf16 %v6228_v17, %v6227_v43  ;;  %v6231_v25 = vld [vmem:[#allocation11_spill] sm:$0xff]  ;;  %v6239_v43 = vld [vmem:[#allocation41_spill] sm:$0xff] }
 0x11f   : > { %867 = vmatmul.mubr.f32.gmra.mrb[60].mxu1 %v866_v61  ;;  %v6236_v61 = vld [vmem:[#allocation12_spill] sm:$0xff]  ;;  %v6240_v17 = vld [vmem:[#allocation47_spill] sm:$0xff] }
 0x120   : > { %876 = vmatprep.mubr.f32.mxu1 %v875_v33  ;;  %v6238_v33 = vld [vmem:[#allocation28_spill] sm:$0xff] }
 0x121   : > { %2186 = vmatmul.mubr.f32.gmra.mrb[60].mxu0 %v864_v59  ;;  %v6230_v59 = vld [vmem:[#allocation32_spill] sm:$0xff] }
 0x122   : > { %2193 = vmatprep.mubr.f32.mxu0 %v873_v21  ;;  %v6232_v21 = vld [vmem:[#allocation25_spill] sm:$0xff] }
 0x123   : > { %882 = vmatmul.mubr.f32.gmra.mrb[62].mxu1 %v881_v63  ;;  %v3161_v63 = vpack.c.bf16 %v6238_v33, %v6237_v48  ;;  %v6247_v48 = vld [vmem:[#allocation15_spill] sm:$0xff]  ;;  %v3170_v33 = vpack.c.bf16 %v4254_v18, %v4244_v10  ;;  %v3176_v18 = vpack.c.bf16 %v4272_v24, %v4269_v23  ;;  %v6254_v23 = vld [vmem:[#allocation70_spill] sm:$0xff]  ;;  %v6255_v24 = vld [vmem:[#allocation73_spill] sm:$0xff] }
 0x124   : > { %1112 = vmatprep.mubr.f32.mxu1 %v6226_v2  ;;  %v6250_v10 = vld [vmem:[#allocation19_spill] sm:$0xff] }
 0x125   : > { %2197 = vmatmul.mubr.f32.gmra.mrb[62].mxu0 %v879_v44  ;;  %v3158_v44 = vpack.c.bf16 %v6233_v28, %v6232_v21  ;;  %v6242_v21 = vld [vmem:[#allocation49_spill] sm:$0xff]  ;;  %v6243_v28 = vld [vmem:[#allocation54_spill] sm:$0xff] }
 0x126   : > { %2363 = vmatprep.mubr.f32.mxu0 %v6226_v2 }
 0x127   : > { %1114 = vmatmul.mubr.f32.vlgmr.msra.gmra.mrb[0].mxu1 %v6229_v30 }
 0x128   : > { %3156 = vmatpush1.bf16.msra.mxu1 %v3155_v49  ;;  %1119 = vmatprep.mubr.f32.mxu1 %v6230_v59  ;;  %v6241_v49 = vld [vmem:[#allocation13_spill] sm:$0xff] }
 0x129   : > { %2365 = vmatmul.mubr.f32.vlgmr.msra.gmra.mrb[0].mxu0 %v6229_v30  ;;  %3157 = vmatprep.subr.bf16.mxu1 %v5984_v53 }
 0x12a   : > { %2370 = vmatprep.mubr.f32.mxu0 %v6230_v59  ;;  %3300 = vmatpush1.bf16.msra.mxu0 %v6231_v25  ;;  %v3164_v25 = vpack.c.bf16 %v4229_v5, %v4224_v3  ;;  %v6245_v3 = vld [vmem:[#allocation57_spill] sm:$0xff]  ;;  %v6246_v5 = vld [vmem:[#allocation59_spill] sm:$0xff] }
 0x12b   : > { %3301 = vmatprep.subr.bf16.mxu0 %v5984_v53  ;;  %1121 = vmatmul.mubr.f32.gmra.mrb[2].mxu1 %v6234_v45 }
 0x12c   : > { %1126 = vmatprep.mubr.f32.mxu1 %v6235_v29  ;;  %3159 = vmatpush1.bf16.msra.mxu1 %v3158_v44  ;;  %v6244_v44 = vld [vmem:[#allocation14_spill] sm:$0xff] }
 0x12d   : > { %2372 = vmatmul.mubr.f32.gmra.mrb[2].mxu0 %v6234_v45  ;;  %3160 = vmatprep.subr.bf16.mxu1 %v5984_v53 }
 0x12e   : > { %2377 = vmatprep.mubr.f32.mxu0 %v6235_v29  ;;  %3303 = vmatpush1.bf16.msra.mxu0 %v6236_v61  ;;  %v3167_v61 = vpack.c.bf16 %v4239_v7, %v4234_v6  ;;  %v6248_v6 = vld [vmem:[#allocation61_spill] sm:$0xff] }
 0x12f   : > { %3304 = vmatprep.subr.bf16.mxu0 %v5984_v53  ;;  %1128 = vmatmul.mubr.f32.gmra.mrb[4].mxu1 %v6239_v43  ;;  %v6249_v7 = vld [vmem:[#allocation17_spill] sm:$0xff] }
 0x130   : > { %1133 = vmatprep.mubr.f32.mxu1 %v6240_v17  ;;  %3162 = vmatpush1.bf16.msra.mxu1 %v3161_v63  ;;  %v3173_v63 = vpack.c.bf16 %v4264_v20, %v4259_v19  ;;  %v6251_v19 = vld [vmem:[#allocation66_spill] sm:$0xff]  ;;  %v6252_v20 = vld [vmem:[#allocation68_spill] sm:$0xff] }
 0x131   : > { %2379 = vmatmul.mubr.f32.gmra.mrb[4].mxu0 %v6239_v43  ;;  %3163 = vmatprep.subr.bf16.mxu1 %v5984_v53 }
 0x132   : > { %2384 = vmatprep.mubr.f32.mxu0 %v6240_v17  ;;  %3306 = vmatpush1.bf16.msra.mxu0 %v6241_v49  ;;  %v6253_v49 = vld [vmem:[#allocation20_spill] sm:$0xff] }
 0x133   : > { %3307 = vmatprep.subr.bf16.mxu0 %v5984_v53  ;;  %1135 = vmatmul.mubr.f32.gmra.mrb[6].mxu1 %v6242_v21 }
 0x134   : > { %1140 = vmatprep.mubr.f32.mxu1 %v6243_v28  ;;  %3165 = vmatpush1.bf16.msra.mxu1 %v3164_v25  ;;  %v6256_v25 = vpack.c.bf16 %v4280_v32, %v4277_v35  ;;  %v6261_v35 = vld [vmem:[#allocation22_spill] sm:$0xff] }
 0x135   : > { %2386 = vmatmul.mubr.f32.gmra.mrb[6].mxu0 %v6242_v21  ;;  %3166 = vmatprep.subr.bf16.mxu1 %v5984_v53  ;;  %v6262_v32 = vld [vmem:[#allocation78_spill] sm:$0xff] }
 0x136   : > { %2391 = vmatprep.mubr.f32.mxu0 %v6243_v28  ;;  %3309 = vmatpush1.bf16.msra.mxu0 %v6244_v44  ;;  %v6257_v44 = vld [vmem:[#allocation21_spill] sm:$0xff] }
 0x137   : > { %3310 = vmatprep.subr.bf16.mxu0 %v5984_v53  ;;  %1142 = vmatmul.mubr.f32.gmra.mrb[8].mxu1 %v6245_v3 }
 0x138   : > { %1147 = vmatprep.mubr.f32.mxu1 %v6246_v5  ;;  %3168 = vmatpush1.bf16.msra.mxu1 %v3167_v61  ;;  %v6258_v61 = vld [vmem:[#allocation74_spill] sm:$0xff] }
 0x139   : > { %2393 = vmatmul.mubr.f32.gmra.mrb[8].mxu0 %v6245_v3  ;;  %3169 = vmatprep.subr.bf16.mxu1 %v5984_v53 }
 0x13a   : > { %2398 = vmatprep.mubr.f32.mxu0 %v6246_v5  ;;  %3312 = vmatpush1.bf16.msra.mxu0 %v6247_v48  ;;  %v6259_v48 = vld [vmem:[#allocation77_spill] sm:$0xff] }
 0x13b   : > { %3313 = vmatprep.subr.bf16.mxu0 %v5984_v53  ;;  %1149 = vmatmul.mubr.f32.gmra.mrb[10].mxu1 %v6248_v6 }
 0x13c   : > { %1154 = vmatprep.mubr.f32.mxu1 %v4463_v11  ;;  %3171 = vmatpush1.bf16.msra.mxu1 %v3170_v33  ;;  %v6260_v33 = vpack.c.bf16 %v4287_v42, %v4282_v36  ;;  %v6265_v36 = vld [vmem:[#allocation29_spill] sm:$0xff]  ;;  %v6266_v42 = vld [vmem:[#allocation83_spill] sm:$0xff] }
 0x13d   : > { %2400 = vmatmul.mubr.f32.gmra.mrb[10].mxu0 %v6248_v6  ;;  %3172 = vmatprep.subr.bf16.mxu1 %v5984_v53 }
 0x13e   : > { %2405 = vmatprep.mubr.f32.mxu0 %v4463_v11  ;;  %3315 = vmatpush1.bf16.msra.mxu0 %v6249_v7  ;;  %v6263_v7 = vld [vmem:[#allocation79_spill] sm:$0xff] }
 0x13f   : > { %3316 = vmatprep.subr.bf16.mxu0 %v5984_v53  ;;  %1156 = vmatmul.mubr.f32.gmra.mrb[12].mxu1 %v4465_v37 }
 0x140   : > { %1161 = vmatprep.mubr.f32.mxu1 %v4493_v1  ;;  %3174 = vmatpush1.bf16.msra.mxu1 %v3173_v63  ;;  %v6264_v63 = vpack.c.bf16 %v4295_v47, %v4290_v38  ;;  %v6269_v38 = vld [vmem:[#allocation31_spill] sm:$0xff]  ;;  %v6270_v47 = vld [vmem:[#allocation86_spill] sm:$0xff] }
 0x141   : > { %2407 = vmatmul.mubr.f32.gmra.mrb[12].mxu0 %v4465_v37  ;;  %3175 = vmatprep.subr.bf16.mxu1 %v5984_v53 }
 0x142   : > { %2412 = vmatprep.mubr.f32.mxu0 %v4493_v1  ;;  %3318 = vmatpush1.bf16.msra.mxu0 %v6250_v10  ;;  %v6267_v10 = vld [vmem:[#allocation84_spill] sm:$0xff] }
 0x143   : > { %3319 = vmatprep.subr.bf16.mxu0 %v5984_v53  ;;  %1163 = vmatmul.mubr.f32.gmra.mrb[14].mxu1 %v6251_v19 }
 0x144   : > { %1168 = vmatprep.mubr.f32.mxu1 %v6252_v20  ;;  %3177 = vmatpush1.bf16.msra.mxu1 %v3176_v18  ;;  %v6268_v18 = vpack.c.bf16 %v4306_v55, %v4304_v54  ;;  %v6273_v54 = vld [vmem:[#allocation34_spill] sm:$0xff]  ;;  %v6274_v55 = vld [vmem:[#allocation91_spill] sm:$0xff] }
 0x145   : > { %2414 = vmatmul.mubr.f32.gmra.mrb[14].mxu0 %v6251_v19  ;;  %3178 = vmatprep.subr.bf16.mxu1 %v5984_v53 }
 0x146   : > { %2419 = vmatprep.mubr.f32.mxu0 %v6252_v20  ;;  %3321 = vmatpush1.bf16.msra.mxu0 %v6253_v49  ;;  %v6271_v49 = vld [vmem:[#allocation88_spill] sm:$0xff] }
 0x147   : > { %3322 = vmatprep.subr.bf16.mxu0 %v5984_v53  ;;  %1170 = vmatmul.mubr.f32.gmra.mrb[16].mxu1 %v6254_v23 }
 0x148   : > { %1175 = vmatprep.mubr.f32.mxu1 %v6255_v24  ;;  %3180 = vmatpush1.bf16.msra.mxu1 %v6256_v25  ;;  %v6272_v25 = vpack.c.bf16 %v6122_v58, %v4312_v60  ;;  %v6276_v60 = vld [vmem:[#allocation42_spill] sm:$0xff]  ;;  %v6277_v58 = vld [vmem:[#allocation93_spill] sm:$0xff] }
 0x149   : > { %2421 = vmatmul.mubr.f32.gmra.mrb[16].mxu0 %v6254_v23  ;;  %3181 = vmatprep.subr.bf16.mxu1 %v5984_v53 }
 0x14a   : > { %2426 = vmatprep.mubr.f32.mxu0 %v6255_v24  ;;  %3324 = vmatpush1.bf16.msra.mxu0 %v6257_v44  ;;  %v6275_v44 = vld [vmem:[#allocation92_spill] sm:$0xff] }
 0x14b   : > { %3325 = vmatprep.subr.bf16.mxu0 %v5984_v53  ;;  %1177 = vmatmul.mubr.f32.gmra.mrb[18].mxu1 %v6258_v61 }
 0x14c   : > { %1182 = vmatprep.mubr.f32.mxu1 %v6259_v48  ;;  %3183 = vmatpush1.bf16.msra.mxu1 %v6260_v33  ;;  %v6278_v33 = vld [vmem:[#allocation96_spill] sm:$0xff] }
 0x14d   : > { %2428 = vmatmul.mubr.f32.gmra.mrb[18].mxu0 %v6258_v61  ;;  %3184 = vmatprep.subr.bf16.mxu1 %v5984_v53 }
 0x14e   : > { %2433 = vmatprep.mubr.f32.mxu0 %v6259_v48  ;;  %3327 = vmatpush1.bf16.msra.mxu0 %v6261_v35  ;;  %v6286_v35 = vld [vmem:[#allocation105_spill] sm:$0xff] }
 0x14f   : > { %3328 = vmatprep.subr.bf16.mxu0 %v5984_v53  ;;  %1184 = vmatmul.mubr.f32.gmra.mrb[20].mxu1 %v6262_v32 }
 0x150   : > { %1189 = vmatprep.mubr.f32.mxu1 %v6263_v7  ;;  %3186 = vmatpush1.bf16.msra.mxu1 %v6264_v63  ;;  %v6290_v63 = vld [vmem:[#allocation112_spill] sm:$0xff] }
 0x151   : > { %2435 = vmatmul.mubr.f32.gmra.mrb[20].mxu0 %v6262_v32  ;;  %3187 = vmatprep.subr.bf16.mxu1 %v5984_v53 }
 0x152   : > { %2440 = vmatprep.mubr.f32.mxu0 %v6263_v7  ;;  %3330 = vmatpush1.bf16.msra.mxu0 %v6265_v36  ;;  %v6291_v36 = vld [vmem:[#allocation113_spill] sm:$0xff] }
 0x153   : > { %3331 = vmatprep.subr.bf16.mxu0 %v5984_v53  ;;  %1191 = vmatmul.mubr.f32.gmra.mrb[22].mxu1 %v6266_v42 }
 0x154   : > { %1196 = vmatprep.mubr.f32.mxu1 %v6267_v10  ;;  %3189 = vmatpush1.bf16.msra.mxu1 %v6268_v18  ;;  %v6292_v18 = vld [vmem:[#allocation115_spill] sm:$0xff] }
 0x155   : > { %2442 = vmatmul.mubr.f32.gmra.mrb[22].mxu0 %v6266_v42  ;;  %3190 = vmatprep.subr.bf16.mxu1 %v5984_v53 }
 0x156   : > { %2447 = vmatprep.mubr.f32.mxu0 %v6267_v10  ;;  %3333 = vmatpush1.bf16.msra.mxu0 %v6269_v38  ;;  %v6293_v38 = vld [vmem:[#allocation118_spill] sm:$0xff] }
 0x157   : > { %3334 = vmatprep.subr.bf16.mxu0 %v5984_v53  ;;  %1198 = vmatmul.mubr.f32.gmra.mrb[24].mxu1 %v6270_v47 }
 0x158   : > { %1203 = vmatprep.mubr.f32.mxu1 %v6271_v49  ;;  %3192 = vmatpush1.bf16.msra.mxu1 %v6272_v25  ;;  %v6294_v25 = vld [vmem:[#allocation121_spill] sm:$0xff] }
 0x159   : > { %2449 = vmatmul.mubr.f32.gmra.mrb[24].mxu0 %v6270_v47  ;;  %3193 = vmatprep.subr.bf16.mxu1 %v5984_v53 }
 0x15a   : > { %2454 = vmatprep.mubr.f32.mxu0 %v6271_v49  ;;  %3336 = vmatpush1.bf16.msra.mxu0 %v6273_v54  ;;  %v6295_v54 = vld [vmem:[#allocation122_spill] sm:$0xff] }
 0x15b   : > { %3337 = vmatprep.subr.bf16.mxu0 %v5984_v53  ;;  %1205 = vmatmul.mubr.f32.gmra.mrb[26].mxu1 %v6274_v55 }
 0x15c   : > { %1210 = vmatprep.mubr.f32.mxu1 %v6275_v44  ;;  %3195 = vmatpush1.bf16.msra.mxu1 %v3194_v22  ;;  %v6281_v22 = vld [vmem:[#allocation99_spill] sm:$0xff] }
 0x15d   : > { %2456 = vmatmul.mubr.f32.gmra.mrb[26].mxu0 %v6274_v55  ;;  %3196 = vmatprep.subr.bf16.mxu1 %v5984_v53 }
 0x15e   : > { %2461 = vmatprep.mubr.f32.mxu0 %v6275_v44  ;;  %3339 = vmatpush1.bf16.msra.mxu0 %v6276_v60  ;;  %v6296_v60 = vld [vmem:[#allocation125_spill] sm:$0xff] }
 0x15f   : > { %3340 = vmatprep.subr.bf16.mxu0 %v5984_v53  ;;  %1212 = vmatmul.mubr.f32.gmra.mrb[28].mxu1 %v6277_v58 }
 0x160   : > { %1217 = vmatprep.mubr.f32.mxu1 %v6278_v33  ;;  %3198 = vmatpush1.bf16.msra.mxu1 %v3197_v50  ;;  %v6284_v50 = vld [vmem:[#allocation101_spill] sm:$0xff] }
 0x161   : > { %2463 = vmatmul.mubr.f32.gmra.mrb[28].mxu0 %v6277_v58  ;;  %3199 = vmatprep.subr.bf16.mxu1 %v5984_v53 }
 0x162   : > { %2468 = vmatprep.mubr.f32.mxu0 %v6278_v33  ;;  %3342 = vmatpush1.bf16.msra.mxu0 %v6279_v0  ;;  %v6297_v0 = vld [vmem:[#allocation127_spill] sm:$0xff] }
 0x163   : > { %3343 = vmatprep.subr.bf16.mxu0 %v5984_v53  ;;  %1219 = vmatmul.mubr.f32.gmra.mrb[30].mxu1 %v6280_v40  ;;  %v6285_v53 = vld [vmem:[#allocation103_spill] sm:$0xff] }
 0x164   : > { %1224 = vmatprep.mubr.f32.mxu1 %v6281_v22  ;;  %3201 = vmatpush1.bf16.msra.mxu1 %v3200_v4  ;;  %v6289_v4 = vld [vmem:[#allocation37_spill] sm:$0xff] }
 0x165   : > { %2470 = vmatmul.mubr.f32.gmra.mrb[30].mxu0 %v6280_v40 }
 0x166   : > { %2475 = vmatprep.mubr.f32.mxu0 %v6281_v22  ;;  %3345 = vmatpush1.bf16.msra.mxu0 %v6282_v52  ;;  %v6298_v52 = vld [vmem:[#allocation129_spill] sm:$0xff] }
 0x167   : > { %1226 = vmatmul.mubr.f32.gmra.mrb[32].mxu1 %v6283_v15 }
 0x168   : > { %1231 = vmatprep.mubr.f32.mxu1 %v6284_v50 }
 0x169   : > { %2477 = vmatmul.mubr.f32.gmra.mrb[32].mxu0 %v6283_v15 }
 0x16a   : > { %2482 = vmatprep.mubr.f32.mxu0 %v6284_v50 }
 0x16b   : > { %1233 = vmatmul.mubr.f32.gmra.mrb[34].mxu1 %v6285_v53 }
 0x16c   : > { %1238 = vmatprep.mubr.f32.mxu1 %v6286_v35 }
 0x16d   : > { %2484 = vmatmul.mubr.f32.gmra.mrb[34].mxu0 %v6285_v53 }
 0x16e   : > { %2489 = vmatprep.mubr.f32.mxu0 %v6286_v35 }
 0x16f   : > { %1240 = vmatmul.mubr.f32.gmra.mrb[36].mxu1 %v6287_v34 }
 0x170   : > { %1245 = vmatprep.mubr.f32.mxu1 %v6288_v13 }
 0x171   : > { %2491 = vmatmul.mubr.f32.gmra.mrb[36].mxu0 %v6287_v34 }
 0x172   : > { %2496 = vmatprep.mubr.f32.mxu0 %v6288_v13 }
 0x173   : > { %1247 = vmatmul.mubr.f32.gmra.mrb[38].mxu1 %v6289_v4 }
 0x174   : > { %1252 = vmatprep.mubr.f32.mxu1 %v5020_v41 }
 0x175   : > { %2498 = vmatmul.mubr.f32.gmra.mrb[38].mxu0 %v6289_v4 }
 0x176   : > { %2503 = vmatprep.mubr.f32.mxu0 %v5020_v41 }
 0x177   : > { %1254 = vmatmul.mubr.f32.gmra.mrb[40].mxu1 %v5031_v46 }
 0x178   : > { %1259 = vmatprep.mubr.f32.mxu1 %v5048_v26 }
 0x179   : > { %2505 = vmatmul.mubr.f32.gmra.mrb[40].mxu0 %v5031_v46 }
 0x17a   : > { %2510 = vmatprep.mubr.f32.mxu0 %v5048_v26 }
 0x17b   : > { %1261 = vmatmul.mubr.f32.gmra.mrb[42].mxu1 %v6290_v63 }
 0x17c   : > { %1266 = vmatprep.mubr.f32.mxu1 %v6291_v36 }
 0x17d   : > { %2512 = vmatmul.mubr.f32.gmra.mrb[42].mxu0 %v6290_v63 }
 0x17e   : > { %2517 = vmatprep.mubr.f32.mxu0 %v6291_v36 }
 0x17f   : > { %1268 = vmatmul.mubr.f32.gmra.mrb[44].mxu1 %v6292_v18 }
 0x180   : > { %1273 = vmatprep.mubr.f32.mxu1 %v6293_v38 }
 0x181   : > { %2519 = vmatmul.mubr.f32.gmra.mrb[44].mxu0 %v6292_v18 }
 0x182   : > { %2524 = vmatprep.mubr.f32.mxu0 %v6293_v38 }
 0x183   : > { %1275 = vmatmul.mubr.f32.gmra.mrb[46].mxu1 %v5103_v62 }
 0x184   : > { %1280 = vmatprep.mubr.f32.mxu1 %v6294_v25 }
 0x185   : > { %2526 = vmatmul.mubr.f32.gmra.mrb[46].mxu0 %v5103_v62 }
 0x186   : > { %2531 = vmatprep.mubr.f32.mxu0 %v6294_v25 }
 0x187   : > { %1282 = vmatmul.mubr.f32.gmra.mrb[48].mxu1 %v6295_v54 }
 0x188   : > { %1287 = vmatprep.mubr.f32.mxu1 %v6296_v60 }
 0x189   : > { %2533 = vmatmul.mubr.f32.gmra.mrb[48].mxu0 %v6295_v54 }
 0x18a   : > { %2538 = vmatprep.mubr.f32.mxu0 %v6296_v60 }
 0x18b   : > { %1289 = vmatmul.mubr.f32.gmra.mrb[50].mxu1 %v6297_v0 }
 0x18c   : > { %1294 = vmatprep.mubr.f32.mxu1 %v6298_v52 }
 0x18d   : > { %2540 = vmatmul.mubr.f32.gmra.mrb[50].mxu0 %v6297_v0 }
 0x18e   : > { %2545 = vmatprep.mubr.f32.mxu0 %v6298_v52 }
 0x18f   : > { %1296 = vmatmul.mubr.f32.gmra.mrb[52].mxu1 %v5154_v9 }
 0x190   : > { %1301 = vmatprep.mubr.f32.mxu1 %v6299_v56 }
 0x191   : > { %2547 = vmatmul.mubr.f32.gmra.mrb[52].mxu0 %v5154_v9 }
 0x192   : > { %2552 = vmatprep.mubr.f32.mxu0 %v6299_v56 }
 0x193   : > { %1303 = vmatmul.mubr.f32.gmra.mrb[54].mxu1 %v6300_v51 }
 0x194   : > { %1308 = vmatprep.mubr.f32.mxu1 %v6301_v39 }
 0x195   : > { %2554 = vmatmul.mubr.f32.gmra.mrb[54].mxu0 %v6300_v51 }
 0x196   : > { %2559 = vmatprep.mubr.f32.mxu0 %v6301_v39 }
 0x197   : > { %1310 = vmatmul.mubr.f32.gmra.mrb[56].mxu1 %v6302_v12 }
 0x198   : > { %1315 = vmatprep.mubr.f32.mxu1 %v6303_v16 }
 0x199   : > { %2561 = vmatmul.mubr.f32.gmra.mrb[56].mxu0 %v6302_v12 }
 0x19a   : > { %2566 = vmatprep.mubr.f32.mxu0 %v6303_v16  ;;  %v6305_v16 = vld [vmem:[#allocation18_spill] sm:$0xff] }
 0x19b   : > { %1317 = vmatmul.mubr.f32.gmra.mrb[58].mxu1 %v5205_v27 }
 0x19c   : > { %1322 = vmatprep.mubr.f32.mxu1 %v5213_v57 }
 0x19d   : > { %2568 = vmatmul.mubr.f32.gmra.mrb[58].mxu0 %v5205_v27  ;;  %v6306_v27 = vld [vmem:[#allocation38_spill] sm:$0xff] }
 0x19e   : > { %2573 = vmatprep.mubr.f32.mxu0 %v5213_v57  ;;  %v6307_v57 = vld [vmem:[#allocation43_spill] sm:$0xff] }
 0x19f   : > { %1324 = vmatmul.mubr.f32.gmra.mrb[60].mxu1 %v6304_v8 }
 0x1a0   : > { %1329 = vmatprep.mubr.f32.mxu1 %v5229_v31 }
 0x1a1   : > { %2575 = vmatmul.mubr.f32.gmra.mrb[60].mxu0 %v6304_v8  ;;  %v6308_v8 = vld [vmem:[#allocation44_spill] sm:$0xff] }
 0x1a2   : > { %2580 = vmatprep.mubr.f32.mxu0 %v5229_v31  ;;  %v6309_v31 = vld [vmem:[#allocation46_spill] sm:$0xff] }
 0x1a3   : > { %1331 = vmatmul.mubr.f32.gmra.mrb[62].mxu1 %v5237_v14 }
 0x1a4   : > { %1466 = vmatprep.mubr.f32.mxu1 %v6305_v16  ;;  %v6311_v16 = vld [vmem:[#allocation55_spill] sm:$0xff] }
 0x1a5   : > { %2582 = vmatmul.mubr.f32.gmra.mrb[62].mxu0 %v5237_v14  ;;  %v6310_v14 = vld [vmem:[#allocation48_spill] sm:$0xff] }
 0x1a6   : > { %2684 = vmatprep.mubr.f32.mxu0 %v6226_v2  ;;  %v6317_v2 = vld [vmem:[#allocation64_spill] sm:$0xff] }
 0x1a7   : > { %1469 = vmatmul.mubr.f32.vlgmr.msra.gmra.mrb[0].mxu1 %v6306_v27  ;;  %v6312_v27 = vld [vmem:[#allocation56_spill] sm:$0xff] }
 0x1a8   : > { %1475 = vmatprep.mubr.f32.mxu1 %v6307_v57  ;;  %v6313_v57 = vld [vmem:[#allocation58_spill] sm:$0xff] }
 0x1a9   : > { %2686 = vmatmul.mubr.f32.vlgmr.msra.gmra.mrb[0].mxu0 %v6229_v30  ;;  %v6318_v30 = vld [vmem:[#allocation65_spill] sm:$0xff] }
 0x1aa   : > { %2691 = vmatprep.mubr.f32.mxu0 %v6230_v59  ;;  %v6319_v59 = vld [vmem:[#allocation67_spill] sm:$0xff] }
 0x1ab   : > { %1478 = vmatmul.mubr.f32.gmra.mrb[2].mxu1 %v6308_v8  ;;  %v6314_v8 = vld [vmem:[#allocation60_spill] sm:$0xff] }
 0x1ac   : > { %1484 = vmatprep.mubr.f32.mxu1 %v6309_v31  ;;  %v6315_v31 = vld [vmem:[#allocation62_spill] sm:$0xff] }
 0x1ad   : > { %2693 = vmatmul.mubr.f32.gmra.mrb[2].mxu0 %v6234_v45  ;;  %v6320_v45 = vld [vmem:[#allocation69_spill] sm:$0xff] }
 0x1ae   : > { %2698 = vmatprep.mubr.f32.mxu0 %v6235_v29  ;;  %v6321_v29 = vld [vmem:[#allocation71_spill] sm:$0xff] }
 0x1af   : > { %1487 = vmatmul.mubr.f32.gmra.mrb[4].mxu1 %v6310_v14  ;;  %v6316_v14 = vld [vmem:[#allocation63_spill] sm:$0xff] }
 0x1b0   : > { %1493 = vmatprep.mubr.f32.mxu1 %v6311_v16  ;;  %v5606_v16 = vld [vmem:[%s5728_s2] ss:$0 sm:$0xff] }
 0x1b1   : > { %2700 = vmatmul.mubr.f32.gmra.mrb[4].mxu0 %v6239_v43  ;;  %v6322_v43 = vld [vmem:[#allocation72_spill] sm:$0xff] }
 0x1b2   : > { %2705 = vmatprep.mubr.f32.mxu0 %v6240_v17  ;;  %v6326_v17 = vld [vmem:[#allocation81_spill] sm:$0xff] }
 0x1b3   : > { %1496 = vmatmul.mubr.f32.gmra.mrb[6].mxu1 %v6312_v27 }
 0x1b4   : > { %1502 = vmatprep.mubr.f32.mxu1 %v6313_v57 }
 0x1b5   : > { %2707 = vmatmul.mubr.f32.gmra.mrb[6].mxu0 %v6242_v21  ;;  %v6327_v21 = vld [vmem:[#allocation82_spill] sm:$0xff] }
 0x1b6   : > { %2712 = vmatprep.mubr.f32.mxu0 %v6243_v28  ;;  %v6328_v28 = vld [vmem:[#allocation85_spill] sm:$0xff] }
 0x1b7   : > { %1505 = vmatmul.mubr.f32.gmra.mrb[8].mxu1 %v6314_v8 }
 0x1b8   : > { %1511 = vmatprep.mubr.f32.mxu1 %v6315_v31 }
 0x1b9   : > { %2714 = vmatmul.mubr.f32.gmra.mrb[8].mxu0 %v6245_v3  ;;  %v6329_v3 = vld [vmem:[#allocation87_spill] sm:$0xff] }
 0x1ba   : > { %2719 = vmatprep.mubr.f32.mxu0 %v6246_v5  ;;  %v6330_v5 = vld [vmem:[#allocation89_spill] sm:$0xff] }
 0x1bb   : > { %1514 = vmatmul.mubr.f32.gmra.mrb[10].mxu1 %v6316_v14 }
 0x1bc   : > { %1520 = vmatprep.mubr.f32.mxu1 %v6317_v2 }
 0x1bd   : > { %2721 = vmatmul.mubr.f32.gmra.mrb[10].mxu0 %v6248_v6  ;;  %v6331_v6 = vld [vmem:[#allocation90_spill] sm:$0xff] }
 0x1be   : > { %2726 = vmatprep.mubr.f32.mxu0 %v4463_v11  ;;  %v6323_v11 = vld [vmem:[#allocation75_spill] sm:$0xff] }
 0x1bf   : > { %1523 = vmatmul.mubr.f32.gmra.mrb[12].mxu1 %v6318_v30 }
 0x1c0   : > { %1529 = vmatprep.mubr.f32.mxu1 %v6319_v59 }
 0x1c1   : > { %2728 = vmatmul.mubr.f32.gmra.mrb[12].mxu0 %v4465_v37  ;;  %v6324_v37 = vld [vmem:[#allocation76_spill] sm:$0xff] }
 0x1c2   : > { %2733 = vmatprep.mubr.f32.mxu0 %v4493_v1  ;;  %v6325_v1 = vld [vmem:[#allocation80_spill] sm:$0xff] }
 0x1c3   : > { %1532 = vmatmul.mubr.f32.gmra.mrb[14].mxu1 %v6320_v45 }
 0x1c4   : > { %1538 = vmatprep.mubr.f32.mxu1 %v6321_v29 }
 0x1c5   : > { %2735 = vmatmul.mubr.f32.gmra.mrb[14].mxu0 %v6251_v19  ;;  %v6332_v19 = vld [vmem:[#allocation94_spill] sm:$0xff] }
 0x1c6   : > { %2740 = vmatprep.mubr.f32.mxu0 %v6252_v20  ;;  %v6333_v20 = vld [vmem:[#allocation95_spill] sm:$0xff] }
 0x1c7   : > { %1541 = vmatmul.mubr.f32.gmra.mrb[16].mxu1 %v6322_v43 }
 0x1c8   : > { %1547 = vmatprep.mubr.f32.mxu1 %v6323_v11 }
 0x1c9   : > { %2742 = vmatmul.mubr.f32.gmra.mrb[16].mxu0 %v6254_v23  ;;  %v6334_v23 = vld [vmem:[#allocation39_spill] sm:$0xff] }
 0x1ca   : > { %2747 = vmatprep.mubr.f32.mxu0 %v6255_v24  ;;  %v6335_v24 = vld [vmem:[#allocation98_spill] sm:$0xff] }
 0x1cb   : > { %1550 = vmatmul.mubr.f32.gmra.mrb[18].mxu1 %v6324_v37 }
 0x1cc   : > { %1556 = vmatprep.mubr.f32.mxu1 %v6325_v1 }
 0x1cd   : > { %2749 = vmatmul.mubr.f32.gmra.mrb[18].mxu0 %v6258_v61  ;;  %v6336_v61 = vld [vmem:[#allocation40_spill] sm:$0xff] }
 0x1ce   : > { %2754 = vmatprep.mubr.f32.mxu0 %v6259_v48  ;;  %v6337_v48 = vld [vmem:[#allocation102_spill] sm:$0xff] }
 0x1cf   : > { %1559 = vmatmul.mubr.f32.gmra.mrb[20].mxu1 %v6326_v17 }
 0x1d0   : > { %1565 = vmatprep.mubr.f32.mxu1 %v6327_v21 }
 0x1d1   : > { %2756 = vmatmul.mubr.f32.gmra.mrb[20].mxu0 %v6262_v32  ;;  %v6338_v32 = vld [vmem:[#allocation45_spill] sm:$0xff] }
 0x1d2   : > { %2761 = vmatprep.mubr.f32.mxu0 %v6263_v7  ;;  %v6339_v7 = vld [vmem:[#allocation104_spill] sm:$0xff] }
 0x1d3   : > { %1568 = vmatmul.mubr.f32.gmra.mrb[22].mxu1 %v6328_v28 }
 0x1d4   : > { %1574 = vmatprep.mubr.f32.mxu1 %v6329_v3 }
 0x1d5   : > { %2763 = vmatmul.mubr.f32.gmra.mrb[22].mxu0 %v6266_v42  ;;  %v6340_v42 = vld [vmem:[#allocation51_spill] sm:$0xff] }
 0x1d6   : > { %2768 = vmatprep.mubr.f32.mxu0 %v6267_v10  ;;  %v6341_v10 = vld [vmem:[#allocation36_spill] sm:$0xff] }
 0x1d7   : > { %1577 = vmatmul.mubr.f32.gmra.mrb[24].mxu1 %v6330_v5 }
 0x1d8   : > { %1583 = vmatprep.mubr.f32.mxu1 %v6331_v6 }
 0x1d9   : > { %2770 = vmatmul.mubr.f32.gmra.mrb[24].mxu0 %v6270_v47  ;;  %v6342_v47 = vld [vmem:[#allocation107_spill] sm:$0xff] }
 0x1da   : > { %2775 = vmatprep.mubr.f32.mxu0 %v6271_v49  ;;  %v6343_v49 = vld [vmem:[#allocation108_spill] sm:$0xff] }
 0x1db   : > { %1586 = vmatmul.mubr.f32.gmra.mrb[26].mxu1 %v6332_v19 }
 0x1dc   : > { %1592 = vmatprep.mubr.f32.mxu1 %v6333_v20 }
 0x1dd   : > { %2777 = vmatmul.mubr.f32.gmra.mrb[26].mxu0 %v6274_v55  ;;  %v6344_v55 = vld [vmem:[#allocation109_spill] sm:$0xff] }
 0x1de   : > { %2782 = vmatprep.mubr.f32.mxu0 %v6275_v44  ;;  %v6345_v44 = vld [vmem:[#allocation110_spill] sm:$0xff] }
 0x1df   : > { %1595 = vmatmul.mubr.f32.gmra.mrb[28].mxu1 %v6334_v23 }
 0x1e0   : > { %1601 = vmatprep.mubr.f32.mxu1 %v6335_v24 }
 0x1e1   : > { %2784 = vmatmul.mubr.f32.gmra.mrb[28].mxu0 %v6277_v58  ;;  %v6346_v58 = vld [vmem:[#allocation111_spill] sm:$0xff] }
 0x1e2   : > { %2789 = vmatprep.mubr.f32.mxu0 %v6278_v33  ;;  %v6347_v33 = vld [vmem:[#allocation114_spill] sm:$0xff] }
 0x1e3   : > { %1604 = vmatmul.mubr.f32.gmra.mrb[30].mxu1 %v6336_v61 }
 0x1e4   : > { %1610 = vmatprep.mubr.f32.mxu1 %v6337_v48 }
 0x1e5   : > { %2791 = vmatmul.mubr.f32.gmra.mrb[30].mxu0 %v6280_v40  ;;  %v6348_v40 = vld [vmem:[#allocation116_spill] sm:$0xff] }
 0x1e6   : > { %2796 = vmatprep.mubr.f32.mxu0 %v6281_v22  ;;  %v6349_v22 = vld [vmem:[#allocation117_spill] sm:$0xff] }
 0x1e7   : > { %1613 = vmatmul.mubr.f32.gmra.mrb[32].mxu1 %v6338_v32 }
 0x1e8   : > { %1619 = vmatprep.mubr.f32.mxu1 %v6339_v7 }
 0x1e9   : > { %2798 = vmatmul.mubr.f32.gmra.mrb[32].mxu0 %v6283_v15  ;;  %v6350_v15 = vld [vmem:[#allocation119_spill] sm:$0xff] }
 0x1ea   : > { %2803 = vmatprep.mubr.f32.mxu0 %v6284_v50  ;;  %v6354_v50 = vld [vmem:[#allocation126_spill] sm:$0xff] }
 0x1eb   : > { %1622 = vmatmul.mubr.f32.gmra.mrb[34].mxu1 %v6340_v42 }
 0x1ec   : > { %1628 = vmatprep.mubr.f32.mxu1 %v6341_v10 }
 0x1ed   : > { %2805 = vmatmul.mubr.f32.gmra.mrb[34].mxu0 %v6285_v53  ;;  %v6355_v53 = vld [vmem:[#allocation128_spill] sm:$0xff] }
 0x1ee   : > { %2810 = vmatprep.mubr.f32.mxu0 %v6286_v35  ;;  %v6356_v35 = vld [vmem:[#allocation130_spill] sm:$0xff] }
 0x1ef   : > { %1631 = vmatmul.mubr.f32.gmra.mrb[36].mxu1 %v6342_v47 }
 0x1f0   : > { %1637 = vmatprep.mubr.f32.mxu1 %v6343_v49 }
 0x1f1   : > { %2812 = vmatmul.mubr.f32.gmra.mrb[36].mxu0 %v6287_v34  ;;  %v6357_v34 = vld [vmem:[#allocation132_spill] sm:$0xff] }
 0x1f2   : > { %2817 = vmatprep.mubr.f32.mxu0 %v6288_v13  ;;  %v6359_v13 = vld [vmem:[#allocation135_spill] sm:$0xff] }
 0x1f3   : > { %1640 = vmatmul.mubr.f32.gmra.mrb[38].mxu1 %v6344_v55 }
 0x1f4   : > { %1646 = vmatprep.mubr.f32.mxu1 %v6345_v44 }
 0x1f5   : > { %2819 = vmatmul.mubr.f32.gmra.mrb[38].mxu0 %v6289_v4  ;;  %v6360_v4 = vld [vmem:[#allocation137_spill] sm:$0xff] }
 0x1f6   : > { %2824 = vmatprep.mubr.f32.mxu0 %v5020_v41  ;;  %v6351_v41 = vld [vmem:[#allocation120_spill] sm:$0xff] }
 0x1f7   : > { %1649 = vmatmul.mubr.f32.gmra.mrb[40].mxu1 %v6346_v58 }
 0x1f8   : > { %1655 = vmatprep.mubr.f32.mxu1 %v6347_v33 }
 0x1f9   : > { %2826 = vmatmul.mubr.f32.gmra.mrb[40].mxu0 %v5031_v46  ;;  %v6352_v46 = vld [vmem:[#allocation123_spill] sm:$0xff] }
 0x1fa   : > { %2831 = vmatprep.mubr.f32.mxu0 %v5048_v26  ;;  %v6353_v26 = vld [vmem:[#allocation124_spill] sm:$0xff] }
 0x1fb   : > { %1658 = vmatmul.mubr.f32.gmra.mrb[42].mxu1 %v6348_v40 }
 0x1fc   : > { %1664 = vmatprep.mubr.f32.mxu1 %v6349_v22 }
 0x1fd   : > { %2833 = vmatmul.mubr.f32.gmra.mrb[42].mxu0 %v6290_v63  ;;  %v6361_v63 = vld [vmem:[#allocation139_spill] sm:$0xff] }
 0x1fe   : > { %2838 = vmatprep.mubr.f32.mxu0 %v6291_v36  ;;  %v6362_v36 = vld [vmem:[#allocation141_spill] sm:$0xff] }
 0x1ff   : > { %1667 = vmatmul.mubr.f32.gmra.mrb[44].mxu1 %v6350_v15 }
 0x200   : > { %1673 = vmatprep.mubr.f32.mxu1 %v6351_v41 }
 0x201   : > { %2840 = vmatmul.mubr.f32.gmra.mrb[44].mxu0 %v6292_v18  ;;  %v6363_v18 = vld [vmem:[#allocation143_spill] sm:$0xff] }
 0x202   : > { %2845 = vmatprep.mubr.f32.mxu0 %v6293_v38  ;;  %v6365_v38 = vld [vmem:[#allocation145_spill] sm:$0xff] }
 0x203   : > { %1676 = vmatmul.mubr.f32.gmra.mrb[46].mxu1 %v6352_v46 }
 0x204   : > { %1682 = vmatprep.mubr.f32.mxu1 %v6353_v26 }
 0x205   : > { %2847 = vmatmul.mubr.f32.gmra.mrb[46].mxu0 %v5103_v62  ;;  %v6358_v62 = vld [vmem:[#allocation134_spill] sm:$0xff] }
 0x206   : > { %2852 = vmatprep.mubr.f32.mxu0 %v6294_v25  ;;  %v6367_v25 = vld [vmem:[#allocation147_spill] sm:$0xff] }
 0x207   : > { %1685 = vmatmul.mubr.f32.gmra.mrb[48].mxu1 %v6354_v50 }
 0x208   : > { %1691 = vmatprep.mubr.f32.mxu1 %v6355_v53 }
 0x209   : > { %2854 = vmatmul.mubr.f32.gmra.mrb[48].mxu0 %v6295_v54  ;;  %v6369_v54 = vld [vmem:[#allocation149_spill] sm:$0xff] }
 0x20a   : > { %2859 = vmatprep.mubr.f32.mxu0 %v6296_v60  ;;  %v6371_v60 = vld [vmem:[#allocation151_spill] sm:$0xff] }
 0x20b   : > { %1694 = vmatmul.mubr.f32.gmra.mrb[50].mxu1 %v6356_v35 }
 0x20c   : > { %1700 = vmatprep.mubr.f32.mxu1 %v6357_v34 }
 0x20d   : > { %2861 = vmatmul.mubr.f32.gmra.mrb[50].mxu0 %v6297_v0  ;;  %v6372_v0 = vld [vmem:[#allocation148_spill] sm:$0xff] }
 0x20e   : > { %2866 = vmatprep.mubr.f32.mxu0 %v6298_v52  ;;  %v6374_v52 = vld [vmem:[#allocation150_spill] sm:$0xff] }
 0x20f   : > { %1703 = vmatmul.mubr.f32.gmra.mrb[52].mxu1 %v6358_v62 }
 0x210   : > { %1709 = vmatprep.mubr.f32.mxu1 %v6359_v13 }
 0x211   : > { %2868 = vmatmul.mubr.f32.gmra.mrb[52].mxu0 %v5154_v9  ;;  %v6364_v9 = vld [vmem:[#allocation140_spill] sm:$0xff] }
 0x212   : > { %2873 = vmatprep.mubr.f32.mxu0 %v6299_v56  ;;  %v6366_v56 = vld [vmem:[#allocation142_spill] sm:$0xff] }
 0x213   : > { %1712 = vmatmul.mubr.f32.gmra.mrb[54].mxu1 %v6360_v4 }
 0x214   : > { %1718 = vmatprep.mubr.f32.mxu1 %v6361_v63 }
 0x215   : > { %2875 = vmatmul.mubr.f32.gmra.mrb[54].mxu0 %v6300_v51  ;;  %v6368_v51 = vld [vmem:[#allocation144_spill] sm:$0xff] }
 0x216   : > { %2880 = vmatprep.mubr.f32.mxu0 %v6301_v39  ;;  %v6370_v39 = vld [vmem:[#allocation146_spill] sm:$0xff] }
 0x217   : > { %1721 = vmatmul.mubr.f32.gmra.mrb[56].mxu1 %v6362_v36 }
 0x218   : > { %1727 = vmatprep.mubr.f32.mxu1 %v6363_v18 }
 0x219   : > { %2882 = vmatmul.mubr.f32.gmra.mrb[56].mxu0 %v6302_v12  ;;  %v6373_v12 = vld [vmem:[#allocation152_spill] sm:$0xff] }
 0x21a   : > { %2887 = vmatprep.mubr.f32.mxu0 %v6364_v9 }
 0x21b   : > { %1730 = vmatmul.mubr.f32.gmra.mrb[58].mxu1 %v6365_v38 }
 0x21c   : > { %1736 = vmatprep.mubr.f32.mxu1 %v6367_v25 }
 0x21d   : > { %2889 = vmatmul.mubr.f32.gmra.mrb[58].mxu0 %v6366_v56 }
 0x21e   : > { %2894 = vmatprep.mubr.f32.mxu0 %v6368_v51 }
 0x21f   : > { %1739 = vmatmul.mubr.f32.gmra.mrb[60].mxu1 %v6369_v54 }
 0x220   : > { %1745 = vmatprep.mubr.f32.mxu1 %v6371_v60 }
 0x221   : > { %2896 = vmatmul.mubr.f32.gmra.mrb[60].mxu0 %v6370_v39 }
 0x222   : > { %2901 = vmatprep.mubr.f32.mxu0 %v6372_v0 }
 0x223   : > { %1748 = vmatmul.mubr.f32.gmra.mrb[62].mxu1 %v6373_v12 }
 0x225   : > { %2903 = vmatmul.mubr.f32.gmra.mrb[62].mxu0 %v6374_v52 }
 0x27a   : > { %v1470_v27 = vpop.f32.mrb[0].mxu1 }
 0x27b   : > { %v3346_v8 = vadd.f32 %v5606_v16, %v1470_v27  ;;  %v1472_v31 = vpop.f32.mrb[1].mxu1 }
 0x27c   : > { %v2687_v57 = vpop.f32.mrb[0].mxu0 }
 0x27d   : > { %v2689_v14 = vpop.f32.mrb[1].mxu0  ;;  %v3347_v2 = vadd.f32 %v3346_v8, %v2687_v57 }
 0x27e   : > { %v1479_v30 = vpop.f32.mrb[2].mxu1 }
 0x27f   : > { %2908 = vst [vmem:[%s5610_s25] sm:$0xff] %v3347_v2  ;;  %v3348_v45 = vadd.f32 %v5606_v16, %v1479_v30  ;;  %v1481_v29 = vpop.f32.mrb[3].mxu1 }
 0x280   : > { %v2694_v59 = vpop.f32.mrb[2].mxu0 }
 0x281   : > { %v2696_v43 = vpop.f32.mrb[3].mxu0  ;;  %v3349_v11 = vadd.f32 %v3348_v45, %v2694_v59 }
 0x282   : > { %v1488_v37 = vpop.f32.mrb[4].mxu1 }
 0x283   : > { %2909 = vst [vmem:[%s5610_s25 + $0x8] sm:$0xff] %v3349_v11  ;;  %v3350_v17 = vadd.f32 %v5606_v16, %v1488_v37  ;;  %v1490_v21 = vpop.f32.mrb[5].mxu1 }
 0x284   : > { %v2701_v1 = vpop.f32.mrb[4].mxu0 }
 0x285   : > { %v2703_v28 = vpop.f32.mrb[5].mxu0  ;;  %v3351_v3 = vadd.f32 %v3350_v17, %v2701_v1 }
 0x286   : > { %v1497_v5 = vpop.f32.mrb[6].mxu1 }
 0x287   : > { %2910 = vst [vmem:[%s5610_s25 + $0x10] sm:$0xff] %v3351_v3  ;;  %v3352_v19 = vadd.f32 %v5606_v16, %v1497_v5  ;;  %v1499_v20 = vpop.f32.mrb[7].mxu1 }
 0x288   : > { %v2708_v6 = vpop.f32.mrb[6].mxu0 }
 0x289   : > { %v2710_v23 = vpop.f32.mrb[7].mxu0  ;;  %v3353_v24 = vadd.f32 %v3352_v19, %v2708_v6 }
 0x28a   : > { %v1506_v61 = vpop.f32.mrb[8].mxu1 }
 0x28b   : > { %2911 = vst [vmem:[%s5610_s25 + $0x18] sm:$0xff] %v3353_v24  ;;  %v3354_v32 = vadd.f32 %v5606_v16, %v1506_v61  ;;  %v1508_v7 = vpop.f32.mrb[9].mxu1 }
 0x28c   : > { %v2715_v48 = vpop.f32.mrb[8].mxu0 }
 0x28d   : > { %v2717_v42 = vpop.f32.mrb[9].mxu0  ;;  %v3355_v10 = vadd.f32 %v3354_v32, %v2715_v48 }
 0x28e   : > { %v1515_v47 = vpop.f32.mrb[10].mxu1 }
 0x28f   : > { %2912 = vst [vmem:[%s5610_s25 + $0x20] sm:$0xff] %v3355_v10  ;;  %v3356_v55 = vadd.f32 %v5606_v16, %v1515_v47  ;;  %v1517_v44 = vpop.f32.mrb[11].mxu1 }
 0x290   : > { %v2722_v49 = vpop.f32.mrb[10].mxu0 }
 0x291   : > { %v2724_v58 = vpop.f32.mrb[11].mxu0  ;;  %v3357_v33 = vadd.f32 %v3356_v55, %v2722_v49 }
 0x292   : > { %v1524_v40 = vpop.f32.mrb[12].mxu1 }
 0x293   : > { %2913 = vst [vmem:[%s5610_s25 + $0x28] sm:$0xff] %v3357_v33  ;;  %v3358_v15 = vadd.f32 %v5606_v16, %v1524_v40  ;;  %v1526_v41 = vpop.f32.mrb[13].mxu1 }
 0x294   : > { %v2729_v22 = vpop.f32.mrb[12].mxu0 }
 0x295   : > { %v2731_v46 = vpop.f32.mrb[13].mxu0  ;;  %v3359_v26 = vadd.f32 %v3358_v15, %v2729_v22 }
 0x296   : > { %v1533_v50 = vpop.f32.mrb[14].mxu1 }
 0x297   : > { %2914 = vst [vmem:[%s5610_s25 + $0x30] sm:$0xff] %v3359_v26  ;;  %v3360_v35 = vadd.f32 %v5606_v16, %v1533_v50  ;;  %v1535_v34 = vpop.f32.mrb[15].mxu1 }
 0x298   : > { %v2736_v53 = vpop.f32.mrb[14].mxu0 }
 0x299   : > { %v2738_v62 = vpop.f32.mrb[15].mxu0  ;;  %v3361_v13 = vadd.f32 %v3360_v35, %v2736_v53 }
 0x29a   : > { %v1542_v4 = vpop.f32.mrb[16].mxu1 }
 0x29b   : > { %2915 = vst [vmem:[%s5610_s25 + $0x38] sm:$0xff] %v3361_v13  ;;  %v3362_v36 = vadd.f32 %v5606_v16, %v1542_v4  ;;  %v1544_v18 = vpop.f32.mrb[17].mxu1 }
 0x29c   : > { %v2743_v63 = vpop.f32.mrb[16].mxu0 }
 0x29d   : > { %v2745_v9 = vpop.f32.mrb[17].mxu0  ;;  %v3363_v38 = vadd.f32 %v3362_v36, %v2743_v63 }
 0x29e   : > { %v1551_v56 = vpop.f32.mrb[18].mxu1 }
 0x29f   : > { %2916 = vst [vmem:[%s5610_s25 + $0x40] sm:$0xff] %v3363_v38  ;;  %v3364_v51 = vadd.f32 %v5606_v16, %v1551_v56  ;;  %v1553_v54 = vpop.f32.mrb[19].mxu1 }
 0x2a0   : > { %v2750_v25 = vpop.f32.mrb[18].mxu0 }
 0x2a1   : > { %v2752_v39 = vpop.f32.mrb[19].mxu0  ;;  %v3365_v60 = vadd.f32 %v3364_v51, %v2750_v25 }
 0x2a2   : > { %v1560_v0 = vpop.f32.mrb[20].mxu1 }
 0x2a3   : > { %2917 = vst [vmem:[%s5610_s25 + $0x48] sm:$0xff] %v3365_v60  ;;  %v3366_v52 = vadd.f32 %v5606_v16, %v1560_v0  ;;  %v1562_v27 = vpop.f32.mrb[21].mxu1 }
 0x2a4   : > { %v2757_v12 = vpop.f32.mrb[20].mxu0 }
 0x2a5   : > { %v2759_v57 = vpop.f32.mrb[21].mxu0  ;;  %v3367_v8 = vadd.f32 %v3366_v52, %v2757_v12 }
 0x2a6   : > { %v1569_v31 = vpop.f32.mrb[22].mxu1 }
 0x2a7   : > { %2918 = vst [vmem:[%s5610_s25 + $0x50] sm:$0xff] %v3367_v8  ;;  %v3368_v2 = vadd.f32 %v5606_v16, %v1569_v31  ;;  %v1571_v30 = vpop.f32.mrb[23].mxu1 }
 0x2a8   : > { %v2764_v14 = vpop.f32.mrb[22].mxu0 }
 0x2a9   : > { %v2766_v59 = vpop.f32.mrb[23].mxu0  ;;  %v3369_v45 = vadd.f32 %v3368_v2, %v2764_v14 }
 0x2aa   : > { %v1578_v29 = vpop.f32.mrb[24].mxu1 }
 0x2ab   : > { %2919 = vst [vmem:[%s5610_s25 + $0x58] sm:$0xff] %v3369_v45  ;;  %v3370_v11 = vadd.f32 %v5606_v16, %v1578_v29  ;;  %v1580_v37 = vpop.f32.mrb[25].mxu1 }
 0x2ac   : > { %v2771_v43 = vpop.f32.mrb[24].mxu0 }
 0x2ad   : > { %v2773_v1 = vpop.f32.mrb[25].mxu0  ;;  %v3371_v17 = vadd.f32 %v3370_v11, %v2771_v43 }
 0x2ae   : > { %v1587_v21 = vpop.f32.mrb[26].mxu1 }
 0x2af   : > { %2920 = vst [vmem:[%s5610_s25 + $0x60] sm:$0xff] %v3371_v17  ;;  %v3372_v3 = vadd.f32 %v5606_v16, %v1587_v21  ;;  %v1589_v5 = vpop.f32.mrb[27].mxu1 }
 0x2b0   : > { %v2778_v28 = vpop.f32.mrb[26].mxu0 }
 0x2b1   : > { %v2780_v6 = vpop.f32.mrb[27].mxu0  ;;  %v3373_v19 = vadd.f32 %v3372_v3, %v2778_v28 }
 0x2b2   : > { %v1596_v20 = vpop.f32.mrb[28].mxu1 }
 0x2b3   : > { %2921 = vst [vmem:[%s5610_s25 + $0x68] sm:$0xff] %v3373_v19  ;;  %v3374_v24 = vadd.f32 %v5606_v16, %v1596_v20  ;;  %v1598_v61 = vpop.f32.mrb[29].mxu1 }
 0x2b4   : > { %v2785_v23 = vpop.f32.mrb[28].mxu0 }
 0x2b5   : > { %v2787_v48 = vpop.f32.mrb[29].mxu0  ;;  %v3375_v32 = vadd.f32 %v3374_v24, %v2785_v23 }
 0x2b6   : > { %v1605_v7 = vpop.f32.mrb[30].mxu1 }
 0x2b7   : > { %2922 = vst [vmem:[%s5610_s25 + $0x70] sm:$0xff] %v3375_v32  ;;  %v3376_v10 = vadd.f32 %v5606_v16, %v1605_v7  ;;  %v1607_v47 = vpop.f32.mrb[31].mxu1 }
 0x2b8   : > { %v2792_v42 = vpop.f32.mrb[30].mxu0 }
 0x2b9   : > { %v2794_v49 = vpop.f32.mrb[31].mxu0  ;;  %v3377_v55 = vadd.f32 %v3376_v10, %v2792_v42 }
 0x2ba   : > { %v1614_v44 = vpop.f32.mrb[32].mxu1 }
 0x2bb   : > { %2923 = vst [vmem:[%s5610_s25 + $0x78] sm:$0xff] %v3377_v55  ;;  %v3378_v33 = vadd.f32 %v5606_v16, %v1614_v44  ;;  %v1616_v40 = vpop.f32.mrb[33].mxu1 }
 0x2bc   : > { %v2799_v58 = vpop.f32.mrb[32].mxu0 }
 0x2bd   : > { %v2801_v22 = vpop.f32.mrb[33].mxu0  ;;  %v3379_v15 = vadd.f32 %v3378_v33, %v2799_v58 }
 0x2be   : > { %v1623_v41 = vpop.f32.mrb[34].mxu1 }
 0x2bf   : > { %2924 = vst [vmem:[%s5610_s25 + $0x80] sm:$0xff] %v3379_v15  ;;  %v3380_v26 = vadd.f32 %v5606_v16, %v1623_v41  ;;  %v1625_v50 = vpop.f32.mrb[35].mxu1 }
 0x2c0   : > { %v2806_v46 = vpop.f32.mrb[34].mxu0 }
 0x2c1   : > { %v2808_v53 = vpop.f32.mrb[35].mxu0  ;;  %v3381_v35 = vadd.f32 %v3380_v26, %v2806_v46 }
 0x2c2   : > { %v1632_v34 = vpop.f32.mrb[36].mxu1 }
 0x2c3   : > { %2925 = vst [vmem:[%s5610_s25 + $0x88] sm:$0xff] %v3381_v35  ;;  %v3382_v13 = vadd.f32 %v5606_v16, %v1632_v34  ;;  %v1634_v4 = vpop.f32.mrb[37].mxu1 }
 0x2c4   : > { %v2813_v62 = vpop.f32.mrb[36].mxu0 }
 0x2c5   : > { %v2815_v63 = vpop.f32.mrb[37].mxu0  ;;  %v3383_v36 = vadd.f32 %v3382_v13, %v2813_v62 }
 0x2c6   : > { %v1641_v18 = vpop.f32.mrb[38].mxu1 }
 0x2c7   : > { %2926 = vst [vmem:[%s5610_s25 + $0x90] sm:$0xff] %v3383_v36  ;;  %v3384_v38 = vadd.f32 %v5606_v16, %v1641_v18  ;;  %v1643_v56 = vpop.f32.mrb[39].mxu1 }
 0x2c8   : > { %v2820_v9 = vpop.f32.mrb[38].mxu0 }
 0x2c9   : > { %v2822_v25 = vpop.f32.mrb[39].mxu0  ;;  %v3385_v51 = vadd.f32 %v3384_v38, %v2820_v9 }
 0x2ca   : > { %v1650_v54 = vpop.f32.mrb[40].mxu1 }
 0x2cb   : > { %2927 = vst [vmem:[%s5610_s25 + $0x98] sm:$0xff] %v3385_v51  ;;  %v3386_v60 = vadd.f32 %v5606_v16, %v1650_v54  ;;  %v1652_v0 = vpop.f32.mrb[41].mxu1 }
 0x2cc   : > { %v2827_v39 = vpop.f32.mrb[40].mxu0 }
 0x2cd   : > { %v2829_v12 = vpop.f32.mrb[41].mxu0  ;;  %v3387_v52 = vadd.f32 %v3386_v60, %v2827_v39 }
 0x2ce   : > { %v1659_v27 = vpop.f32.mrb[42].mxu1 }
 0x2cf   : > { %2928 = vst [vmem:[%s5610_s25 + $0xa0] sm:$0xff] %v3387_v52  ;;  %v3388_v8 = vadd.f32 %v5606_v16, %v1659_v27  ;;  %v1661_v31 = vpop.f32.mrb[43].mxu1 }
 0x2d0   : > { %v2834_v57 = vpop.f32.mrb[42].mxu0 }
 0x2d1   : > { %v2836_v14 = vpop.f32.mrb[43].mxu0  ;;  %v3389_v2 = vadd.f32 %v3388_v8, %v2834_v57 }
 0x2d2   : > { %v1668_v30 = vpop.f32.mrb[44].mxu1 }
 0x2d3   : > { %2929 = vst [vmem:[%s5610_s25 + $0xa8] sm:$0xff] %v3389_v2  ;;  %v3390_v45 = vadd.f32 %v5606_v16, %v1668_v30  ;;  %v1670_v29 = vpop.f32.mrb[45].mxu1 }
 0x2d4   : > { %v2841_v59 = vpop.f32.mrb[44].mxu0 }
 0x2d5   : > { %v2843_v43 = vpop.f32.mrb[45].mxu0  ;;  %v3391_v11 = vadd.f32 %v3390_v45, %v2841_v59 }
 0x2d6   : > { %v1677_v37 = vpop.f32.mrb[46].mxu1 }
 0x2d7   : > { %2930 = vst [vmem:[%s5610_s25 + $0xb0] sm:$0xff] %v3391_v11  ;;  %v3392_v17 = vadd.f32 %v5606_v16, %v1677_v37  ;;  %v1679_v21 = vpop.f32.mrb[47].mxu1 }
 0x2d8   : > { %v2848_v1 = vpop.f32.mrb[46].mxu0 }
 0x2d9   : > { %v2850_v28 = vpop.f32.mrb[47].mxu0  ;;  %v3393_v3 = vadd.f32 %v3392_v17, %v2848_v1 }
 0x2da   : > { %v1686_v5 = vpop.f32.mrb[48].mxu1 }
 0x2db   : > { %2931 = vst [vmem:[%s5610_s25 + $0xb8] sm:$0xff] %v3393_v3  ;;  %v3394_v19 = vadd.f32 %v5606_v16, %v1686_v5  ;;  %v1688_v20 = vpop.f32.mrb[49].mxu1 }
 0x2dc   : > { %v2855_v6 = vpop.f32.mrb[48].mxu0 }
 0x2dd   : > { %v2857_v23 = vpop.f32.mrb[49].mxu0  ;;  %v3395_v24 = vadd.f32 %v3394_v19, %v2855_v6 }
 0x2de   : > { %v1695_v61 = vpop.f32.mrb[50].mxu1 }
 0x2df   : > { %2932 = vst [vmem:[%s5610_s25 + $0xc0] sm:$0xff] %v3395_v24  ;;  %v3396_v32 = vadd.f32 %v5606_v16, %v1695_v61  ;;  %v1697_v7 = vpop.f32.mrb[51].mxu1 }
 0x2e0   : > { %v2862_v48 = vpop.f32.mrb[50].mxu0 }
 0x2e1   : > { %v2864_v42 = vpop.f32.mrb[51].mxu0  ;;  %v3397_v10 = vadd.f32 %v3396_v32, %v2862_v48 }
 0x2e2   : > { %v1704_v47 = vpop.f32.mrb[52].mxu1 }
 0x2e3   : > { %2933 = vst [vmem:[%s5610_s25 + $0xc8] sm:$0xff] %v3397_v10  ;;  %v3398_v55 = vadd.f32 %v5606_v16, %v1704_v47  ;;  %v1706_v44 = vpop.f32.mrb[53].mxu1 }
 0x2e4   : > { %v2869_v49 = vpop.f32.mrb[52].mxu0 }
 0x2e5   : > { %v2871_v58 = vpop.f32.mrb[53].mxu0  ;;  %v3399_v33 = vadd.f32 %v3398_v55, %v2869_v49 }
 0x2e6   : > { %v1713_v40 = vpop.f32.mrb[54].mxu1 }
 0x2e7   : > { %2934 = vst [vmem:[%s5610_s25 + $0xd0] sm:$0xff] %v3399_v33  ;;  %v3400_v15 = vadd.f32 %v5606_v16, %v1713_v40  ;;  %v1715_v41 = vpop.f32.mrb[55].mxu1 }
 0x2e8   : > { %v2876_v22 = vpop.f32.mrb[54].mxu0 }
 0x2e9   : > { %v2878_v46 = vpop.f32.mrb[55].mxu0  ;;  %v3401_v26 = vadd.f32 %v3400_v15, %v2876_v22 }
 0x2ea   : > { %v1722_v50 = vpop.f32.mrb[56].mxu1 }
 0x2eb   : > { %2935 = vst [vmem:[%s5610_s25 + $0xd8] sm:$0xff] %v3401_v26  ;;  %v3402_v35 = vadd.f32 %v5606_v16, %v1722_v50  ;;  %v1724_v34 = vpop.f32.mrb[57].mxu1 }
 0x2ec   : > { %v2883_v53 = vpop.f32.mrb[56].mxu0 }
 0x2ed   : > { %v2885_v62 = vpop.f32.mrb[57].mxu0  ;;  %v3403_v13 = vadd.f32 %v3402_v35, %v2883_v53 }
 0x2ee   : > { %v1731_v4 = vpop.f32.mrb[58].mxu1 }
 0x2ef   : > { %2936 = vst [vmem:[%s5610_s25 + $0xe0] sm:$0xff] %v3403_v13  ;;  %v3404_v36 = vadd.f32 %v5606_v16, %v1731_v4  ;;  %v1733_v18 = vpop.f32.mrb[59].mxu1 }
 0x2f0   : > { %v2890_v63 = vpop.f32.mrb[58].mxu0 }
 0x2f1   : > { %v2892_v9 = vpop.f32.mrb[59].mxu0  ;;  %v3405_v38 = vadd.f32 %v3404_v36, %v2890_v63 }
 0x2f2   : > { %v1740_v56 = vpop.f32.mrb[60].mxu1 }
 0x2f3   : > { %2937 = vst [vmem:[%s5610_s25 + $0xe8] sm:$0xff] %v3405_v38  ;;  %v3406_v51 = vadd.f32 %v5606_v16, %v1740_v56  ;;  %v1742_v54 = vpop.f32.mrb[61].mxu1 }
 0x2f4   : > { %v2897_v25 = vpop.f32.mrb[60].mxu0 }
 0x2f5   : > { %v2899_v39 = vpop.f32.mrb[61].mxu0  ;;  %v3407_v60 = vadd.f32 %v3406_v51, %v2897_v25 }
 0x2f6   : > { %v1749_v0 = vpop.f32.mrb[62].mxu1 }
 0x2f7   : > { %2938 = vst [vmem:[%s5610_s25 + $0xf0] sm:$0xff] %v3407_v60  ;;  %v3408_v52 = vadd.f32 %v5606_v16, %v1749_v0  ;;  %v1751_v27 = vpop.f32.mrb[63].mxu1 }
 0x2f8   : > { %v2904_v12 = vpop.f32.mrb[62].mxu0 }
 0x2f9   : > { %v2906_v57 = vpop.f32.mrb[63].mxu0  ;;  %v3409_v8 = vadd.f32 %v3408_v52, %v2904_v12 }
 0x2fb   : > { %2939 = vst [vmem:[%s5610_s25 + $0xf8] sm:$0xff] %v3409_v8 }
 0x2fc   : > { %3801 = shalt.err (!%p3798_p7)
}
 0x2fd   : > { %s3802_s22 = scalar_lea.hbm %s5679_s27, 4096  ;;  %s3806_s9 = scalar_lea.hbm %s5729_s3, 8192 }
 0x2fe   : > { %p3803_p9 = scmp.ne.s32.totalorder %s5679_s27, %s3802_s22  ;;  %p3807_p5 = scmp.lt.u32.totalorder %s5679_s27, %s5729_s3 }
 0x2ff   : > { %p3808_p11 = scmp.lt.u32.totalorder %s3806_s9, %s3802_s22  ;;  %p3810_p4 = scmp.lt.u32.totalorder %s3802_s22, %s5679_s27 }
 0x300   : > { %p3804_p2 = pnand %p3803_p9, %p3981_p12 }
 0x301   : > { %p3809_p1 = por %p3808_p11, %p3807_p5 }
 0x302   : > { %p3805_p0 = pneg %p3804_p2 }
 0x303   : > { %p3811_p6 = por %p3810_p4, %p3809_p1 }
 0x305   : > { %p3812_p8 = pnand %p3811_p6, %p3805_p0 }
 0x307   : > { %3815 = shalt.err (!%p3812_p8)
}
 0x308   : > { %s3868_s4 = smov 128   ;;  %s3869_s25 = smov 8  }
 0x309   : > { %3672 = dma.vmem_to_hbm [thread:$0]  (%p3981_p12), %s5681_s5, 4096, %s5679_s27, %s2941_s16, %s3868_s4, %s3868_s4, %s3869_s25  }
 0x30a PF: > { %s2969_s26 = sand.u32 1, %s3846_s12   ;;  %p6375_p10 = scmp.ne.s32.totalorder %s5943_s19, 0 }
 0x30b   : > { %p6376_p13 = scmp.ge.s32.totalorder %s3858_s15, 2  ;;  %s2970_s10 = scalar_lea.sflag [#allocation4], %s2969_s26 }
 0x30d   : > { %p3683_p3 = pnand %p6376_p13, %p6375_p10 }
 0x30f   : > { %3841 = dma.done.wait (!%p3683_p3), %s2970_s10, 4096  }
 0x310   : > { %3843 = vsyncadd (!%p3683_p3), %s2970_s10, 4294963200  ;;  %p17_p7 = scmp.ge.s32.totalorder %s3946_s24, 4   ;;  %s6377_s12 = smov %s3850_s13 }
 0x311   : > { %s6378_s13 = smov %s3854_s14  ;;  %s6379_s14 = smov %s3977_s17 }
 0x312   : > { %s6380_s15 = smov %s3946_s24  ;;  %19 = sbr.rel (!%p17_p7) target bundleno = 6 (0x6), region = 81 }
 0x319   :  { %2975 = vsyncpa [#allocation3], 1 }
 0x31a   :  { %2977 = vsyncpa [#allocation3 + $0x1], 1 }
 0x31b   :  { %2978 = vsyncpa [#allocation6], 1 }
 0x31c   :  { %2979 = vsyncpa [#allocation4], 1 }
 0x31d   :  { %2981 = vsyncpa [#allocation4 + $0x1], 1 }

</bundles_post_ra>
